<compile_context>
chip_gen: v6e
topology: v6e:2x2x1
jax: 0.10.0
libtpu: 0.0.40
codegen_flags: <defaults>
</compile_context>

<pallas_src>
import functools

import jax
import jax.numpy as jnp
from jax import lax
from jax.experimental import pallas as pl
from jax.experimental.pallas import tpu as pltpu


def _round_up(x, m):
    return (x + m - 1) // m * m


def _pick_img_block(n):
    """Largest image block in {8,4,2} that divides n and keeps >=2 grid steps."""
    for blk in (8, 4, 2):
        if n % blk == 0 and n // blk >= 2:
            return blk
    return 1


# ---------------------------------------------------------------------------
# Kernels
# ---------------------------------------------------------------------------
def _conv_pool_kernel(x_ref, w_ref, b_ref, o_ref, *, blk, phase_rows,
                      valid_pos, out_ch, out_rows):
    """Fused conv (single K-stacked dot) + 2x2 maxpool + bias + ReLU.

    x_ref: (blk, 4*phase_rows, K) bf16 im2col rows, ordered as four pool-phase
           blocks of `phase_rows` rows (first `valid_pos` rows of each valid).
    w_ref: (K, 128) bf16 packed conv weight.  b_ref: (1, 128) f32 bias.
    o_ref: (blk, out_rows, out_ch) bf16 pooled + relu'd activations.
    Pool/bias/ReLU commute (bias shared across phases, relu monotone), so we
    pool the raw dot result and apply bias+ReLU once on the pooled tile.
    """
    for b in range(blk):
        acc = jnp.dot(x_ref[b], w_ref[...],
                      preferred_element_type=jnp.float32)          # (4*PR, 128) f32
        pooled = jnp.maximum(
            jnp.maximum(acc[0:valid_pos],
                        acc[phase_rows:phase_rows + valid_pos]),
            jnp.maximum(acc[2 * phase_rows:2 * phase_rows + valid_pos],
                        acc[3 * phase_rows:3 * phase_rows + valid_pos]))
        pooled = jnp.maximum(pooled + b_ref[...], 0.0)              # bias + ReLU
        val = pooled[:, :out_ch].astype(jnp.bfloat16)
        if out_rows > valid_pos:                                    # zero row pad
            val = jnp.concatenate(
                [val, jnp.zeros((out_rows - valid_pos, out_ch), jnp.bfloat16)],
                axis=0)
        o_ref[b] = val


def _fused_fc_kernel(x_ref, w1_ref, b1_ref, w2_ref, b2_ref, w3_ref, b3_ref,
                     o_ref):
    """fc1+ReLU -> fc2+ReLU -> fc3 fused (bf16 MXU operands, f32 accumulation)."""
    x = x_ref[...]
    h = jnp.dot(x, w1_ref[...], preferred_element_type=jnp.float32) + b1_ref[...]
    h = jnp.maximum(h, 0.0).astype(jnp.bfloat16)
    h = jnp.dot(h, w2_ref[...], preferred_element_type=jnp.float32) + b2_ref[...]
    h = jnp.maximum(h, 0.0).astype(jnp.bfloat16)
    o_ref[...] = (jnp.dot(h, w3_ref[...], preferred_element_type=jnp.float32)
                  + b3_ref[...])


# ---------------------------------------------------------------------------
# pallas_call wrappers
# ---------------------------------------------------------------------------
def conv_relu_pool(lhs, w, b, *, out_rows, out_ch, phase_rows, valid_pos, blk):
    n, m, k = lhs.shape
    flops = n * 2 * m * k * w.shape[1]
    bytes_acc = (lhs.size * 2 + w.size * 2 + b.size * 4
                 + n * out_rows * out_ch * 2)
    return pl.pallas_call(
        functools.partial(_conv_pool_kernel, blk=blk, phase_rows=phase_rows,
                          valid_pos=valid_pos, out_ch=out_ch, out_rows=out_rows),
        out_shape=jax.ShapeDtypeStruct((n, out_rows, out_ch), jnp.bfloat16),
        grid=(n // blk,),
        in_specs=[
            pl.BlockSpec((blk, m, k), lambda i: (i, 0, 0)),
            pl.BlockSpec(w.shape, lambda i: (0, 0)),
            pl.BlockSpec((1, 128), lambda i: (0, 0)),
        ],
        out_specs=pl.BlockSpec((blk, out_rows, out_ch), lambda i: (i, 0, 0)),
        compiler_params=pltpu.CompilerParams(dimension_semantics=("parallel",)),
        cost_estimate=pl.CostEstimate(flops=flops, transcendentals=0,
                                      bytes_accessed=bytes_acc),
    )(lhs, w, b)


def fused_fc(x, w1, b1, w2, b2, w3, b3):
    n, k = x.shape
    n_pad = _round_up(max(n, 8), 8)
    tb = min(128, n_pad)
    n_pad = _round_up(n_pad, tb)
    if n_pad != n:
        x = jnp.pad(x, ((0, n_pad - n), (0, 0)))
    flops = 2 * n_pad * (k * 128 + 128 * 128 + 128 * 128)
    bytes_acc = (x.size * 2 + (w1.size + w2.size + w3.size) * 2
                 + n_pad * 128 * 4)
    out = pl.pallas_call(
        _fused_fc_kernel,
        out_shape=jax.ShapeDtypeStruct((n_pad, 128), jnp.float32),
        grid=(n_pad // tb,),
        in_specs=[
            pl.BlockSpec((tb, k), lambda i: (i, 0)),
            pl.BlockSpec(w1.shape, lambda i: (0, 0)),
            pl.BlockSpec((1, 128), lambda i: (0, 0)),
            pl.BlockSpec(w2.shape, lambda i: (0, 0)),
            pl.BlockSpec((1, 128), lambda i: (0, 0)),
            pl.BlockSpec(w3.shape, lambda i: (0, 0)),
            pl.BlockSpec((1, 128), lambda i: (0, 0)),
        ],
        out_specs=pl.BlockSpec((tb, 128), lambda i: (i, 0)),
        compiler_params=pltpu.CompilerParams(dimension_semantics=("parallel",)),
        cost_estimate=pl.CostEstimate(flops=flops, transcendentals=0,
                                      bytes_accessed=bytes_acc),
    )(x, w1, b1, w2, b2, w3, b3)
    return out[:n]


# ---------------------------------------------------------------------------
# Parameters (torch layout) + one-time packing into kernel-friendly form
# ---------------------------------------------------------------------------
def init_lenet_params(key):
    def uniform(key, shape, fan_in):
        bound = 1.0 / jnp.sqrt(jnp.float32(fan_in))
        return jax.random.uniform(key, shape, jnp.float32, -bound, bound)

    ks = jax.random.split(key, 10)
    return {
        "conv1_w": uniform(ks[0], (16, 3, 5, 5), 3 * 25),
        "conv1_b": uniform(ks[1], (16,), 3 * 25),
        "conv2_w": uniform(ks[2], (32, 16, 5, 5), 16 * 25),
        "conv2_b": uniform(ks[3], (32,), 16 * 25),
        # fc1_w rows follow torch's view(-1, 800) order: f = c*25 + py*5 + px
        "fc1_w": uniform(ks[4], (800, 120), 800),
        "fc1_b": uniform(ks[5], (120,), 800),
        "fc2_w": uniform(ks[6], (120, 84), 120),
        "fc2_b": uniform(ks[7], (84,), 120),
        "fc3_w": uniform(ks[8], (84, 10), 84),
        "fc3_b": uniform(ks[9], (10,), 84),
    }


def pack_params(p):
    """One-time repack into bf16, K-stacked, 128-lane matrices."""
    # conv weights: (oc, ci, kh, kw) -> (kh*kw*ci, oc), K index = (i*5+j)*cin + ci
    w1c = jnp.transpose(p["conv1_w"], (2, 3, 1, 0)).reshape(75, 16)
    w1c = jnp.pad(w1c, ((0, 128 - 75), (0, 128 - 16))).astype(jnp.bfloat16)
    b1c = jnp.pad(p["conv1_b"], (0, 128 - 16)).reshape(1, 128).astype(jnp.float32)

    w2c = jnp.transpose(p["conv2_w"], (2, 3, 1, 0)).reshape(400, 32)
    w2c = jnp.pad(w2c, ((0, 512 - 400), (0, 128 - 32))).astype(jnp.bfloat16)
    b2c = jnp.pad(p["conv2_b"], (0, 128 - 32)).reshape(1, 128).astype(jnp.float32)

    # fc1: torch feature f = c*25 + p (p = py*5+px)  ->  packed g = p*32 + c
    fw1 = p["fc1_w"].reshape(32, 25, 120).transpose(1, 0, 2)     # (p, c, out)
    fw1 = jnp.pad(fw1, ((0, 7), (0, 0), (0, 8)))                 # (32, 32, 128)
    fw1 = fw1.reshape(1024, 128).astype(jnp.bfloat16)
    fb1 = jnp.pad(p["fc1_b"], (0, 8)).reshape(1, 128).astype(jnp.float32)

    fw2 = jnp.pad(p["fc2_w"], ((0, 8), (0, 44))).astype(jnp.bfloat16)
    fb2 = jnp.pad(p["fc2_b"], (0, 44)).reshape(1, 128).astype(jnp.float32)
    fw3 = jnp.pad(p["fc3_w"], ((0, 44), (0, 118))).astype(jnp.bfloat16)
    fb3 = jnp.pad(p["fc3_b"], (0, 118)).reshape(1, 128).astype(jnp.float32)

    return dict(w1c=w1c, b1c=b1c, w2c=w2c, b2c=b2c,
                fw1=fw1, fb1=fb1, fw2=fw2, fb2=fb2, fw3=fw3, fb3=fb3)


# ---------------------------------------------------------------------------
# Forward pass
# ---------------------------------------------------------------------------
@jax.jit
def lenet_forward(pp, x):
    n = x.shape[0]
    blk = _pick_img_block(n)

    # ---- conv1 im2col (layout plumbing in XLA; ~200 KB bf16 / image) ----
    xr = jnp.transpose(x, (0, 2, 3, 1))                          # (N, 32, 32, 3)
    pat1 = jnp.concatenate(
        [xr[:, i:i + 28, j:j + 28, :] for i in range(5) for j in range(5)],
        axis=-1)                                                 # (N, 28, 28, 75)
    # reorder rows into 4 pool-phase blocks of 196 (padded to 200) positions
    pat1 = pat1.reshape(n, 14, 2, 14, 2, 75).transpose(0, 2, 4, 1, 3, 5)
    pat1 = pat1.reshape(n, 4, 196, 75)
    lhs1 = jnp.pad(pat1, ((0, 0), (0, 0), (0, 4), (0, 53)))
    lhs1 = lhs1.reshape(n, 800, 128).astype(jnp.bfloat16)

    # ---- fused conv1 + ReLU + pool1 -> (N, 196, 16) bf16 ----
    p1 = conv_relu_pool(lhs1, pp["w1c"], pp["b1c"], out_rows=196, out_ch=16,
                        phase_rows=200, valid_pos=196, blk=blk)

    # ---- conv2 im2col (~128 KB bf16 / image) ----
    p1g = p1.reshape(n, 14, 14, 16)
    pat2 = jnp.concatenate(
        [p1g[:, i:i + 10, j:j + 10, :] for i in range(5) for j in range(5)],
        axis=-1)                                                 # (N, 10, 10, 400)
    pat2 = pat2.reshape(n, 5, 2, 5, 2, 400).transpose(0, 2, 4, 1, 3, 5)
    pat2 = pat2.reshape(n, 4, 25, 400)
    lhs2 = jnp.pad(pat2, ((0, 0), (0, 0), (0, 7), (0, 112)))
    lhs2 = lhs2.reshape(n, 128, 512)                             # bf16 already

    # ---- fused conv2 + ReLU + pool2 -> (N, 32, 32) bf16 (compact features) ----
    p2 = conv_relu_pool(lhs2, pp["w2c"], pp["b2c"], out_rows=32, out_ch=32,
                        phase_rows=32, valid_pos=25, blk=blk)

    # ---- fused fc1+ReLU -> fc2+ReLU -> fc3 ----
    feats = p2.reshape(n, 1024)                                  # free reshape
    logits = fused_fc(feats, pp["fw1"], pp["fb1"], pp["fw2"], pp["fb2"],
                      pp["fw3"], pp["fb3"])
    return logits[:, :10]


# ---------------------------------------------------------------------------
# Pure-JAX reference (f32) for a tolerance check against the bf16 kernels
# ---------------------------------------------------------------------------
def lenet_reference(p, x):
    dn = ("NCHW", "OIHW", "NCHW")
    y = lax.conv_general_dilated(x, p["conv1_w"], (1, 1), "VALID",
                                 dimension_numbers=dn)
    y = jax.nn.relu(y + p["conv1_b"].reshape(1, -1, 1, 1))
    y = lax.reduce_window(y, -jnp.inf, lax.max, (1, 1, 2, 2), (1, 1, 2, 2),
                          "VALID")
    y = lax.conv_general_dilated(y, p["conv2_w"], (1, 1), "VALID",
                                 dimension_numbers=dn)
    y = jax.nn.relu(y + p["conv2_b"].reshape(1, -1, 1, 1))
    y = lax.reduce_window(y, -jnp.inf, lax.max, (1, 1, 2, 2), (1, 1, 2, 2),
                          "VALID")
    f = y.reshape(y.shape[0], -1)                                # (N, 800)
    h = jax.nn.relu(f @ p["fc1_w"] + p["fc1_b"])
    h = jax.nn.relu(h @ p["fc2_w"] + p["fc2_b"])
    return h @ p["fc3_w"] + p["fc3_b"]


if __name__ == "__main__":
    key = jax.random.PRNGKey(0)
    pkey, xkey = jax.random.split(key)
    params = init_lenet_params(pkey)
    packed = pack_params(params)
    # Input must be 3x32x32 so the flatten yields 800 features.
    x = jax.random.normal(xkey, (2, 3, 32, 32), dtype=jnp.float32)

    out = lenet_forward(packed, x)
    jax.block_until_ready(out)
    assert out.shape == (2, 10) and out.dtype == jnp.float32

    ref = lenet_reference(params, x)
    max_err = float(jnp.max(jnp.abs(out - ref)))
    assert max_err < 1e-1, f"kernel/reference mismatch: max abs err {max_err}"
    print("KERNEL_OK")
</pallas_src>

<mosaic_0001>
module attributes {stable_mosaic.version = 11 : i64} {
  func.func @_conv_pool_kernel(%arg0: i32, %arg1: memref<1x800x128xbf16, #tpu.memory_space<vmem>>, %arg2: memref<128x128xbf16, #tpu.memory_space<vmem>>, %arg3: memref<1x128xf32, #tpu.memory_space<vmem>>, %arg4: memref<1x196x16xbf16, #tpu.memory_space<vmem>>) attributes {dimension_semantics = [#tpu.dimension_semantics<parallel>], iteration_bounds = array<i64: 2>, scalar_prefetch = 0 : i64, scratch_operands = 0 : i64, tpu.core_type = #tpu.core_type<tc>, window_params = [{transform_indices = @transform_0, window_bounds = array<i64: 1, 800, 128>}, {pipeline_mode = #tpu.pipeline_mode<synchronous>, transform_indices = @transform_1, window_bounds = array<i64: 128, 128>}, {pipeline_mode = #tpu.pipeline_mode<synchronous>, transform_indices = @transform_2, window_bounds = array<i64: 1, 128>}, {transform_indices = @transform_3, window_bounds = array<i64: 1, 196, 16>}]} {
    %c0 = arith.constant 0 : index
    %c0_0 = arith.constant 0 : index
    %c0_1 = arith.constant 0 : index
    %0 = vector.load %arg1[%c0, %c0_0, %c0_1] : memref<1x800x128xbf16, #tpu.memory_space<vmem>>, vector<1x800x128xbf16>
    %1 = vector.shape_cast %0 : vector<1x800x128xbf16> to vector<800x128xbf16>
    %c0_2 = arith.constant 0 : index
    %c0_3 = arith.constant 0 : index
    %2 = vector.load %arg2[%c0_2, %c0_3] : memref<128x128xbf16, #tpu.memory_space<vmem>>, vector<128x128xbf16>
    %cst = arith.constant dense<0.000000e+00> : vector<800x128xf32>
    %3 = tpu.matmul %1, %2, %cst {dimension_numbers = #tpu.dot_dimension_numbers<[1], [0], [0], [1], [0, 0, 1, 1], [], []>} : vector<800x128xbf16>, vector<128x128xbf16>, vector<800x128xf32> -> vector<800x128xf32>
    %4 = vector.extract_strided_slice %3 {offsets = [0, 0], sizes = [196, 128], strides = [1, 1]} : vector<800x128xf32> to vector<196x128xf32>
    %5 = vector.extract_strided_slice %3 {offsets = [200, 0], sizes = [196, 128], strides = [1, 1]} : vector<800x128xf32> to vector<196x128xf32>
    %6 = arith.maximumf %4, %5 : vector<196x128xf32>
    %7 = vector.extract_strided_slice %3 {offsets = [400, 0], sizes = [196, 128], strides = [1, 1]} : vector<800x128xf32> to vector<196x128xf32>
    %8 = vector.extract_strided_slice %3 {offsets = [600, 0], sizes = [196, 128], strides = [1, 1]} : vector<800x128xf32> to vector<196x128xf32>
    %9 = arith.maximumf %7, %8 : vector<196x128xf32>
    %10 = arith.maximumf %6, %9 : vector<196x128xf32>
    %c0_4 = arith.constant 0 : index
    %c0_5 = arith.constant 0 : index
    %11 = vector.load %arg3[%c0_4, %c0_5] : memref<1x128xf32, #tpu.memory_space<vmem>>, vector<1x128xf32>
    %12 = vector.broadcast %11 : vector<1x128xf32> to vector<196x128xf32>
    %13 = arith.addf %10, %12 : vector<196x128xf32>
    %cst_6 = arith.constant 0.000000e+00 : f32
    %14 = vector.broadcast %cst_6 : f32 to vector<196x128xf32>
    %15 = arith.maximumf %13, %14 : vector<196x128xf32>
    %16 = vector.extract_strided_slice %15 {offsets = [0, 0], sizes = [196, 16], strides = [1, 1]} : vector<196x128xf32> to vector<196x16xf32>
    %17 = arith.truncf %16 : vector<196x16xf32> to vector<196x16xbf16>
    %c0_7 = arith.constant 0 : index
    %c0_8 = arith.constant 0 : index
    %c0_9 = arith.constant 0 : index
    %18 = vector.load %arg4[%c0_7, %c0_8, %c0_9] : memref<1x196x16xbf16, #tpu.memory_space<vmem>>, vector<1x196x16xbf16>
    %19 = vector.shape_cast %18 : vector<1x196x16xbf16> to vector<196x16xbf16>
    %20 = vector.shape_cast %17 : vector<196x16xbf16> to vector<1x196x16xbf16>
    tpu.vector_store %arg4[%c0_7, %c0_8, %c0_9], %20 {strides = array<i32>} : memref<1x196x16xbf16, #tpu.memory_space<vmem>>, vector<1x196x16xbf16>,
    return
  }
  func.func @transform_0(%arg0: i32) -> (i32, i32, i32) {
    %c0_i32 = arith.constant 0 : i32
    %c0_i32_0 = arith.constant 0 : i32
    %c0_i32_1 = arith.constant 0 : i32
    return %arg0, %c0_i32, %c0_i32_0 : i32, i32, i32
  }
  func.func @transform_1(%arg0: i32) -> (i32, i32) {
    %c0_i32 = arith.constant 0 : i32
    %c0_i32_0 = arith.constant 0 : i32
    %c0_i32_1 = arith.constant 0 : i32
    return %c0_i32, %c0_i32_0 : i32, i32
  }
  func.func @transform_2(%arg0: i32) -> (i32, i32) {
    %c0_i32 = arith.constant 0 : i32
    %c0_i32_0 = arith.constant 0 : i32
    %c0_i32_1 = arith.constant 0 : i32
    return %c0_i32, %c0_i32_0 : i32, i32
  }
  func.func @transform_3(%arg0: i32) -> (i32, i32, i32) {
    %c0_i32 = arith.constant 0 : i32
    %c0_i32_0 = arith.constant 0 : i32
    %c0_i32_1 = arith.constant 0 : i32
    return %arg0, %c0_i32, %c0_i32_0 : i32, i32, i32
  }
}

module attributes {stable_mosaic.version = 11 : i64} {
  func.func @_conv_pool_kernel(%arg0: i32, %arg1: memref<1x128x512xbf16, #tpu.memory_space<vmem>>, %arg2: memref<512x128xbf16, #tpu.memory_space<vmem>>, %arg3: memref<1x128xf32, #tpu.memory_space<vmem>>, %arg4: memref<1x32x32xbf16, #tpu.memory_space<vmem>>) attributes {dimension_semantics = [#tpu.dimension_semantics<parallel>], iteration_bounds = array<i64: 2>, scalar_prefetch = 0 : i64, scratch_operands = 0 : i64, tpu.core_type = #tpu.core_type<tc>, window_params = [{transform_indices = @transform_0, window_bounds = array<i64: 1, 128, 512>}, {pipeline_mode = #tpu.pipeline_mode<synchronous>, transform_indices = @transform_1, window_bounds = array<i64: 512, 128>}, {pipeline_mode = #tpu.pipeline_mode<synchronous>, transform_indices = @transform_2, window_bounds = array<i64: 1, 128>}, {transform_indices = @transform_3, window_bounds = array<i64: 1, 32, 32>}]} {
    %c0 = arith.constant 0 : index
    %c0_0 = arith.constant 0 : index
    %c0_1 = arith.constant 0 : index
    %0 = vector.load %arg1[%c0, %c0_0, %c0_1] : memref<1x128x512xbf16, #tpu.memory_space<vmem>>, vector<1x128x512xbf16>
    %1 = vector.shape_cast %0 : vector<1x128x512xbf16> to vector<128x512xbf16>
    %c0_2 = arith.constant 0 : index
    %c0_3 = arith.constant 0 : index
    %2 = vector.load %arg2[%c0_2, %c0_3] : memref<512x128xbf16, #tpu.memory_space<vmem>>, vector<512x128xbf16>
    %cst = arith.constant dense<0.000000e+00> : vector<128x128xf32>
    %3 = tpu.matmul %1, %2, %cst {dimension_numbers = #tpu.dot_dimension_numbers<[1], [0], [0], [1], [0, 0, 1, 1], [], []>} : vector<128x512xbf16>, vector<512x128xbf16>, vector<128x128xf32> -> vector<128x128xf32>
    %4 = vector.extract_strided_slice %3 {offsets = [0, 0], sizes = [25, 128], strides = [1, 1]} : vector<128x128xf32> to vector<25x128xf32>
    %5 = vector.extract_strided_slice %3 {offsets = [32, 0], sizes = [25, 128], strides = [1, 1]} : vector<128x128xf32> to vector<25x128xf32>
    %6 = arith.maximumf %4, %5 : vector<25x128xf32>
    %7 = vector.extract_strided_slice %3 {offsets = [64, 0], sizes = [25, 128], strides = [1, 1]} : vector<128x128xf32> to vector<25x128xf32>
    %8 = vector.extract_strided_slice %3 {offsets = [96, 0], sizes = [25, 128], strides = [1, 1]} : vector<128x128xf32> to vector<25x128xf32>
    %9 = arith.maximumf %7, %8 : vector<25x128xf32>
    %10 = arith.maximumf %6, %9 : vector<25x128xf32>
    %c0_4 = arith.constant 0 : index
    %c0_5 = arith.constant 0 : index
    %11 = vector.load %arg3[%c0_4, %c0_5] : memref<1x128xf32, #tpu.memory_space<vmem>>, vector<1x128xf32>
    %12 = vector.broadcast %11 : vector<1x128xf32> to vector<25x128xf32>
    %13 = arith.addf %10, %12 : vector<25x128xf32>
    %cst_6 = arith.constant 0.000000e+00 : f32
    %14 = vector.broadcast %cst_6 : f32 to vector<25x128xf32>
    %15 = arith.maximumf %13, %14 : vector<25x128xf32>
    %16 = vector.extract_strided_slice %15 {offsets = [0, 0], sizes = [25, 32], strides = [1, 1]} : vector<25x128xf32> to vector<25x32xf32>
    %17 = arith.truncf %16 : vector<25x32xf32> to vector<25x32xbf16>
    %cst_7 = arith.constant 0.000000e+00 : bf16
    %18 = vector.broadcast %cst_7 : bf16 to vector<7x32xbf16>
    %19 = tpu.concatenate %17, %18 in 0 : vector<25x32xbf16>, vector<7x32xbf16> -> vector<32x32xbf16>
    %c0_8 = arith.constant 0 : index
    %c0_9 = arith.constant 0 : index
    %c0_10 = arith.constant 0 : index
    %20 = vector.load %arg4[%c0_8, %c0_9, %c0_10] : memref<1x32x32xbf16, #tpu.memory_space<vmem>>, vector<1x32x32xbf16>
    %21 = vector.shape_cast %20 : vector<1x32x32xbf16> to vector<32x32xbf16>
    %22 = vector.shape_cast %19 : vector<32x32xbf16> to vector<1x32x32xbf16>
    tpu.vector_store %arg4[%c0_8, %c0_9, %c0_10], %22 {strides = array<i32>} : memref<1x32x32xbf16, #tpu.memory_space<vmem>>, vector<1x32x32xbf16>,
    return
  }
  func.func @transform_0(%arg0: i32) -> (i32, i32, i32) {
    %c0_i32 = arith.constant 0 : i32
    %c0_i32_0 = arith.constant 0 : i32
    %c0_i32_1 = arith.constant 0 : i32
    return %arg0, %c0_i32, %c0_i32_0 : i32, i32, i32
  }
  func.func @transform_1(%arg0: i32) -> (i32, i32) {
    %c0_i32 = arith.constant 0 : i32
    %c0_i32_0 = arith.constant 0 : i32
    %c0_i32_1 = arith.constant 0 : i32
    return %c0_i32, %c0_i32_0 : i32, i32
  }
  func.func @transform_2(%arg0: i32) -> (i32, i32) {
    %c0_i32 = arith.constant 0 : i32
    %c0_i32_0 = arith.constant 0 : i32
    %c0_i32_1 = arith.constant 0 : i32
    return %c0_i32, %c0_i32_0 : i32, i32
  }
  func.func @transform_3(%arg0: i32) -> (i32, i32, i32) {
    %c0_i32 = arith.constant 0 : i32
    %c0_i32_0 = arith.constant 0 : i32
    %c0_i32_1 = arith.constant 0 : i32
    return %arg0, %c0_i32, %c0_i32_0 : i32, i32, i32
  }
}

module attributes {stable_mosaic.version = 11 : i64} {
  func.func @_fused_fc_kernel(%arg0: i32, %arg1: memref<8x1024xbf16, #tpu.memory_space<vmem>>, %arg2: memref<1024x128xbf16, #tpu.memory_space<vmem>>, %arg3: memref<1x128xf32, #tpu.memory_space<vmem>>, %arg4: memref<128x128xbf16, #tpu.memory_space<vmem>>, %arg5: memref<1x128xf32, #tpu.memory_space<vmem>>, %arg6: memref<128x128xbf16, #tpu.memory_space<vmem>>, %arg7: memref<1x128xf32, #tpu.memory_space<vmem>>, %arg8: memref<8x128xf32, #tpu.memory_space<vmem>>) attributes {dimension_semantics = [#tpu.dimension_semantics<parallel>], iteration_bounds = array<i64: 1>, scalar_prefetch = 0 : i64, scratch_operands = 0 : i64, tpu.core_type = #tpu.core_type<tc>, window_params = [{transform_indices = @transform_0, window_bounds = array<i64: 8, 1024>}, {pipeline_mode = #tpu.pipeline_mode<synchronous>, transform_indices = @transform_1, window_bounds = array<i64: 1024, 128>}, {pipeline_mode = #tpu.pipeline_mode<synchronous>, transform_indices = @transform_2, window_bounds = array<i64: 1, 128>}, {pipeline_mode = #tpu.pipeline_mode<synchronous>, transform_indices = @transform_3, window_bounds = array<i64: 128, 128>}, {pipeline_mode = #tpu.pipeline_mode<synchronous>, transform_indices = @transform_4, window_bounds = array<i64: 1, 128>}, {pipeline_mode = #tpu.pipeline_mode<synchronous>, transform_indices = @transform_5, window_bounds = array<i64: 128, 128>}, {pipeline_mode = #tpu.pipeline_mode<synchronous>, transform_indices = @transform_6, window_bounds = array<i64: 1, 128>}, {transform_indices = @transform_7, window_bounds = array<i64: 8, 128>}]} {
    %c0 = arith.constant 0 : index
    %c0_0 = arith.constant 0 : index
    %0 = vector.load %arg1[%c0, %c0_0] : memref<8x1024xbf16, #tpu.memory_space<vmem>>, vector<8x1024xbf16>
    %c0_1 = arith.constant 0 : index
    %c0_2 = arith.constant 0 : index
    %1 = vector.load %arg2[%c0_1, %c0_2] : memref<1024x128xbf16, #tpu.memory_space<vmem>>, vector<1024x128xbf16>
    %cst = arith.constant dense<0.000000e+00> : vector<8x128xf32>
    %2 = tpu.matmul %0, %1, %cst {dimension_numbers = #tpu.dot_dimension_numbers<[1], [0], [0], [1], [0, 0, 1, 1], [], []>} : vector<8x1024xbf16>, vector<1024x128xbf16>, vector<8x128xf32> -> vector<8x128xf32>
    %c0_3 = arith.constant 0 : index
    %c0_4 = arith.constant 0 : index
    %3 = vector.load %arg3[%c0_3, %c0_4] : memref<1x128xf32, #tpu.memory_space<vmem>>, vector<1x128xf32>
    %4 = vector.broadcast %3 : vector<1x128xf32> to vector<8x128xf32>
    %5 = arith.addf %2, %4 : vector<8x128xf32>
    %cst_5 = arith.constant 0.000000e+00 : f32
    %6 = vector.broadcast %cst_5 : f32 to vector<8x128xf32>
    %7 = arith.maximumf %5, %6 : vector<8x128xf32>
    %8 = arith.truncf %7 : vector<8x128xf32> to vector<8x128xbf16>
    %c0_6 = arith.constant 0 : index
    %c0_7 = arith.constant 0 : index
    %9 = vector.load %arg4[%c0_6, %c0_7] : memref<128x128xbf16, #tpu.memory_space<vmem>>, vector<128x128xbf16>
    %cst_8 = arith.constant dense<0.000000e+00> : vector<8x128xf32>
    %10 = tpu.matmul %8, %9, %cst_8 {dimension_numbers = #tpu.dot_dimension_numbers<[1], [0], [0], [1], [0, 0, 1, 1], [], []>} : vector<8x128xbf16>, vector<128x128xbf16>, vector<8x128xf32> -> vector<8x128xf32>
    %c0_9 = arith.constant 0 : index
    %c0_10 = arith.constant 0 : index
    %11 = vector.load %arg5[%c0_9, %c0_10] : memref<1x128xf32, #tpu.memory_space<vmem>>, vector<1x128xf32>
    %12 = vector.broadcast %11 : vector<1x128xf32> to vector<8x128xf32>
    %13 = arith.addf %10, %12 : vector<8x128xf32>
    %cst_11 = arith.constant 0.000000e+00 : f32
    %14 = vector.broadcast %cst_11 : f32 to vector<8x128xf32>
    %15 = arith.maximumf %13, %14 : vector<8x128xf32>
    %16 = arith.truncf %15 : vector<8x128xf32> to vector<8x128xbf16>
    %c0_12 = arith.constant 0 : index
    %c0_13 = arith.constant 0 : index
    %17 = vector.load %arg6[%c0_12, %c0_13] : memref<128x128xbf16, #tpu.memory_space<vmem>>, vector<128x128xbf16>
    %cst_14 = arith.constant dense<0.000000e+00> : vector<8x128xf32>
    %18 = tpu.matmul %16, %17, %cst_14 {dimension_numbers = #tpu.dot_dimension_numbers<[1], [0], [0], [1], [0, 0, 1, 1], [], []>} : vector<8x128xbf16>, vector<128x128xbf16>, vector<8x128xf32> -> vector<8x128xf32>
    %c0_15 = arith.constant 0 : index
    %c0_16 = arith.constant 0 : index
    %19 = vector.load %arg7[%c0_15, %c0_16] : memref<1x128xf32, #tpu.memory_space<vmem>>, vector<1x128xf32>
    %20 = vector.broadcast %19 : vector<1x128xf32> to vector<8x128xf32>
    %21 = arith.addf %18, %20 : vector<8x128xf32>
    %c0_17 = arith.constant 0 : index
    %c0_18 = arith.constant 0 : index
    %22 = vector.load %arg8[%c0_17, %c0_18] : memref<8x128xf32, #tpu.memory_space<vmem>>, vector<8x128xf32>
    tpu.vector_store %arg8[%c0_17, %c0_18], %21 {strides = array<i32>} : memref<8x128xf32, #tpu.memory_space<vmem>>, vector<8x128xf32>,
    return
  }
  func.func @transform_0(%arg0: i32) -> (i32, i32) {
    %c0_i32 = arith.constant 0 : i32
    %c0_i32_0 = arith.constant 0 : i32
    return %arg0, %c0_i32 : i32, i32
  }
  func.func @transform_1(%arg0: i32) -> (i32, i32) {
    %c0_i32 = arith.constant 0 : i32
    %c0_i32_0 = arith.constant 0 : i32
    %c0_i32_1 = arith.constant 0 : i32
    return %c0_i32, %c0_i32_0 : i32, i32
  }
  func.func @transform_2(%arg0: i32) -> (i32, i32) {
    %c0_i32 = arith.constant 0 : i32
    %c0_i32_0 = arith.constant 0 : i32
    %c0_i32_1 = arith.constant 0 : i32
    return %c0_i32, %c0_i32_0 : i32, i32
  }
  func.func @transform_3(%arg0: i32) -> (i32, i32) {
    %c0_i32 = arith.constant 0 : i32
    %c0_i32_0 = arith.constant 0 : i32
    %c0_i32_1 = arith.constant 0 : i32
    return %c0_i32, %c0_i32_0 : i32, i32
  }
  func.func @transform_4(%arg0: i32) -> (i32, i32) {
    %c0_i32 = arith.constant 0 : i32
    %c0_i32_0 = arith.constant 0 : i32
    %c0_i32_1 = arith.constant 0 : i32
    return %c0_i32, %c0_i32_0 : i32, i32
  }
  func.func @transform_5(%arg0: i32) -> (i32, i32) {
    %c0_i32 = arith.constant 0 : i32
    %c0_i32_0 = arith.constant 0 : i32
    %c0_i32_1 = arith.constant 0 : i32
    return %c0_i32, %c0_i32_0 : i32, i32
  }
  func.func @transform_6(%arg0: i32) -> (i32, i32) {
    %c0_i32 = arith.constant 0 : i32
    %c0_i32_0 = arith.constant 0 : i32
    %c0_i32_1 = arith.constant 0 : i32
    return %c0_i32, %c0_i32_0 : i32, i32
  }
  func.func @transform_7(%arg0: i32) -> (i32, i32) {
    %c0_i32 = arith.constant 0 : i32
    %c0_i32_0 = arith.constant 0 : i32
    return %arg0, %c0_i32 : i32, i32
  }
}

</mosaic_0001>

<bundles_post_ra>
// kernel: lenet_forward.3
= control target key start
LH: loop header
LB: loop body
LE: loop exit
PB: predicated region body
PF: predicated region fallthrough
CT: control target
= control target key end

     0   :  { %s1788_s12 = smov 0   ;;  %s2113_s0 = inlined_call_operand.vmem [shape: bf16[2,800,128], index: 0, kind: input, shape index: {}]   ;;  %s2114_s1 = inlined_call_operand.vmem [shape: bf16[128,128], index: 1, kind: input, shape index: {}]   ;;  %s2115_s2 = inlined_call_operand.vmem [shape: f32[1,128], index: 2, kind: input, shape index: {}]   ;;  %s2116_s3 = inlined_call_operand.vmem [shape: bf16[2,196,16], index: 3, kind: output, shape index: {}]  }
   0x1 LB: > { %s1384_s13 = sadd.s32 4294967295, %s1766_s12   ;;  %p1388_p0 = scmp.ge.s32.totalorder %s1766_s12, 1  ;;  %s1766_s12 = sphi %s1788_s12, %s13_s12  }
   0x2   : > { %p137_p1 = scmp.lt.s32.totalorder %s1766_s12, 3 }
   0x4   : > { %p138_p2 = pnand %p1388_p0, %p137_p1 }
   0x6   : > { %141 = sbr.rel (%p138_p2) target bundleno = 351 (0x15f), region = 32 }
   0xb   : > { %v1702_v0 = vld [vmem:[%s2114_s1 + $0x38] sm:$0xff]   ;;  %p161_p3 = scmp.lt.s32.totalorder %s1384_s13, 1  ;;  %v1703_v1 = vld [vmem:[%s2114_s1 + $0x30] sm:$0xff]   ;;  %v1704_v2 = vld [vmem:[%s2114_s1 + $0x28] sm:$0xff]   ;;  %vm1302_vm0 = vcmask 125952   ;;  %vm1327_vm1 = vcmask 123904  }
   0xc   : > { %1560 = vmatprep.subr.bf16.mxu0 %v1702_v0  ;;  %1676 = vmatprep.subr.bf16.mxu1 %v1702_v0  ;;  %v1705_v3 = vld [vmem:[%s2114_s1 + $0x20] sm:$0xff]   ;;  %v1706_v6 = vld [vmem:[%s2114_s1 + $0x18] sm:$0xff]   ;;  %v1707_v7 = vld [vmem:[%s2114_s1 + $0x10] sm:$0xff]  }
   0xd   : > { %s2132_s13 = smov (!%p161_p3, %s1384_s13), 1  ;;  %1561 = vmatpush3.bf16.msra.mxu0 %v1702_v0  ;;  %1684 = vmatpush3.bf16.msra.mxu1 %v1702_v0  ;;  %v1708_v8 = vld [vmem:[%s2114_s1 + $0x8] sm:$0xff]   ;;  %v1709_v9 = vld [vmem:[%s2114_s1] sm:$0xff]  }
   0xe   : > { %1562 = vmatprep.subr.bf16.mxu0 %v1703_v1  ;;  %1677 = vmatprep.subr.bf16.mxu1 %v1703_v1  ;;  %s1692_s20 = smul.u32 400, %s2132_s13 }
   0xf   : > { %s1693_s9 = smul.u32 100, %s2132_s13 }
  0x10   : > { %s1811_s23 = scalar_lea.vmem %s2113_s0, %s1692_s20 }
  0x11   : > { %1563 = vmatpush3.bf16.msra.mxu0 %v1703_v1  ;;  %1685 = vmatpush3.bf16.msra.mxu1 %v1703_v1  ;;  %v1710_v4 = vld [vmem:[%s1811_s23] sm:$0xff]   ;;  %v1711_v5 = vld [vmem:[%s1811_s23 + $0xd0] sm:$0xff]   ;;  %v1712_v10 = vld [vmem:[%s1811_s23 + $0x8] sm:$0xff]   ;;  %s1990_s13 = scalar_lea.vmem %s2116_s3, %s1693_s9 }
  0x12   : > { %1564 = vmatprep.subr.bf16.mxu0 %v1704_v2  ;;  %1678 = vmatprep.subr.bf16.mxu1 %v1704_v2  ;;  %v1713_v11 = vld [vmem:[%s1811_s23 + $0xd8] sm:$0xff]   ;;  %v1714_v12 = vld [vmem:[%s1811_s23 + $0x10] sm:$0xff]   ;;  %v1715_v13 = vld [vmem:[%s1811_s23 + $0xe0] sm:$0xff]  }
  0x13   : > { %1576 = vmatprep.mubr.bf16.mxu0 %v1710_v4  ;;  %1628 = vmatprep.mubr.bf16.mxu1 %v1711_v5  ;;  %v1716_v14 = vld [vmem:[%s1811_s23 + $0x18] sm:$0xff]   ;;  %v1717_v15 = vld [vmem:[%s1811_s23 + $0xe8] sm:$0xff]   ;;  %v1718_v16 = vld [vmem:[%s1811_s23 + $0x20] sm:$0xff]  }
  0x14   : > { %v1719_v17 = vld [vmem:[%s1811_s23 + $0xf0] sm:$0xff]   ;;  %v1720_v18 = vld [vmem:[%s1811_s23 + $0x28] sm:$0xff]   ;;  %v1721_v19 = vld [vmem:[%s1811_s23 + $0xf8] sm:$0xff]  }
  0x15   : > { %1565 = vmatpush3.bf16.msra.mxu0 %v1704_v2  ;;  %1686 = vmatpush3.bf16.msra.mxu1 %v1704_v2  ;;  %v1722_v20 = vld [vmem:[%s1811_s23 + $0x30] sm:$0xff]   ;;  %v1723_v21 = vld [vmem:[%s1811_s23 + $0x100] sm:$0xff]   ;;  %v1724_v22 = vld [vmem:[%s1811_s23 + $0x38] sm:$0xff]  }
  0x16   : > { %1566 = vmatprep.subr.bf16.mxu0 %v1705_v3  ;;  %1679 = vmatprep.subr.bf16.mxu1 %v1705_v3  ;;  %v1725_v23 = vld [vmem:[%s1811_s23 + $0x108] sm:$0xff]   ;;  %v1726_v24 = vld [vmem:[%s1811_s23 + $0x40] sm:$0xff]   ;;  %v1727_v25 = vld [vmem:[%s1811_s23 + $0x110] sm:$0xff]  }
  0x17   : > { %v1728_v26 = vld [vmem:[%s1811_s23 + $0x48] sm:$0xff]   ;;  %v1729_v27 = vld [vmem:[%s1811_s23 + $0x118] sm:$0xff]   ;;  %v1730_v28 = vld [vmem:[%s1811_s23 + $0x50] sm:$0xff]  }
  0x18   : > { %v1731_v29 = vld [vmem:[%s1811_s23 + $0x120] sm:$0xff]   ;;  %v1732_v30 = vld [vmem:[%s1811_s23 + $0x58] sm:$0xff]   ;;  %v1733_v31 = vld [vmem:[%s1811_s23 + $0x128] sm:$0xff]  }
  0x19   : > { %1567 = vmatpush3.bf16.msra.mxu0 %v1705_v3  ;;  %1687 = vmatpush3.bf16.msra.mxu1 %v1705_v3  ;;  %v1734_v32 = vld [vmem:[%s1811_s23 + $0x60] sm:$0xff]   ;;  %v1735_v33 = vld [vmem:[%s1811_s23 + $0x130] sm:$0xff]   ;;  %v1736_v34 = vld [vmem:[%s1811_s23 + $0x68] sm:$0xff]  }
  0x1a   : > { %1568 = vmatprep.subr.bf16.mxu0 %v1706_v6  ;;  %1680 = vmatprep.subr.bf16.mxu1 %v1706_v6  ;;  %v1737_v35 = vld [vmem:[%s1811_s23 + $0x138] sm:$0xff]   ;;  %v1738_v36 = vld [vmem:[%s1811_s23 + $0x70] sm:$0xff]   ;;  %v1739_v37 = vld [vmem:[%s1811_s23 + $0x140] sm:$0xff]  }
  0x1b   : > { %v1740_v38 = vld [vmem:[%s1811_s23 + $0x78] sm:$0xff]   ;;  %v1741_v39 = vld [vmem:[%s1811_s23 + $0x148] sm:$0xff]   ;;  %v1742_v40 = vld [vmem:[%s1811_s23 + $0x80] sm:$0xff]  }
  0x1c   : > { %v1743_v41 = vld [vmem:[%s1811_s23 + $0x150] sm:$0xff]   ;;  %v1744_v42 = vld [vmem:[%s1811_s23 + $0x88] sm:$0xff]   ;;  %v1745_v43 = vld [vmem:[%s1811_s23 + $0x158] sm:$0xff]  }
  0x1d   : > { %1569 = vmatpush3.bf16.msra.mxu0 %v1706_v6  ;;  %1688 = vmatpush3.bf16.msra.mxu1 %v1706_v6  ;;  %v1746_v44 = vld [vmem:[%s1811_s23 + $0x90] sm:$0xff]   ;;  %v1747_v45 = vld [vmem:[%s1811_s23 + $0x160] sm:$0xff]   ;;  %v1748_v46 = vld [vmem:[%s1811_s23 + $0x98] sm:$0xff]  }
  0x1e   : > { %1570 = vmatprep.subr.bf16.mxu0 %v1707_v7  ;;  %1681 = vmatprep.subr.bf16.mxu1 %v1707_v7  ;;  %v1749_v47 = vld [vmem:[%s1811_s23 + $0x168] sm:$0xff]   ;;  %v1750_v48 = vld [vmem:[%s1811_s23 + $0xa0] sm:$0xff]   ;;  %v1751_v49 = vld [vmem:[%s1811_s23 + $0x170] sm:$0xff]  }
  0x1f   : > { %v1752_v50 = vld [vmem:[%s1811_s23 + $0xa8] sm:$0xff]   ;;  %v1753_v51 = vld [vmem:[%s1811_s23 + $0x178] sm:$0xff]   ;;  %v1754_v52 = vld [vmem:[%s1811_s23 + $0xb0] sm:$0xff]  }
  0x20   : > { %v1755_v53 = vld [vmem:[%s1811_s23 + $0x180] sm:$0xff]   ;;  %v1756_v54 = vld [vmem:[%s1811_s23 + $0xb8] sm:$0xff]   ;;  %v1757_v55 = vld [vmem:[%s1811_s23 + $0x188] sm:$0xff]  }
  0x21   : > { %1571 = vmatpush3.bf16.msra.mxu0 %v1707_v7  ;;  %1689 = vmatpush3.bf16.msra.mxu1 %v1707_v7  ;;  %v1758_v56 = vld [vmem:[%s1811_s23 + $0xc0] sm:$0xff]   ;;  %v1759_v57 = vld [vmem:[%s1811_s23 + $0xc8] sm:$0xff]  }
  0x22   : > { %1572 = vmatprep.subr.bf16.mxu0 %v1708_v8  ;;  %1682 = vmatprep.subr.bf16.mxu1 %v1708_v8 }
  0x25   : > { %1573 = vmatpush3.bf16.msra.mxu0 %v1708_v8  ;;  %1690 = vmatpush3.bf16.msra.mxu1 %v1708_v8 }
  0x26   : > { %1574 = vmatprep.subr.bf16.mxu0 %v1709_v9  ;;  %1683 = vmatprep.subr.bf16.mxu1 %v1709_v9 }
  0x29   : > { %1575 = vmatpush3.bf16.msra.mxu0 %v1709_v9  ;;  %1691 = vmatpush3.bf16.msra.mxu1 %v1709_v9 }
  0x2c   : > { %1577 = vmatmul.mubr.bf16.vlgmr.msra.gmra.mxu0 %v1712_v10  ;;  %1629 = vmatmul.mubr.bf16.vlgmr.msra.gmra.mxu1 %v1713_v11 }
  0x2d   : > { %1580 = vmatprep.mubr.bf16.mxu0 %v1714_v12  ;;  %1632 = vmatprep.mubr.bf16.mxu1 %v1715_v13 }
  0x34   : > { %1581 = vmatmul.mubr.bf16.gmra.mxu0 %v1716_v14  ;;  %1633 = vmatmul.mubr.bf16.gmra.mxu1 %v1717_v15 }
  0x35   : > { %1584 = vmatprep.mubr.bf16.mxu0 %v1718_v16  ;;  %1636 = vmatprep.mubr.bf16.mxu1 %v1719_v17 }
  0x3c   : > { %1585 = vmatmul.mubr.bf16.gmra.mxu0 %v1720_v18  ;;  %1637 = vmatmul.mubr.bf16.gmra.mxu1 %v1721_v19 }
  0x3d   : > { %1588 = vmatprep.mubr.bf16.mxu0 %v1722_v20  ;;  %1640 = vmatprep.mubr.bf16.mxu1 %v1723_v21 }
  0x44   : > { %1589 = vmatmul.mubr.bf16.gmra.mxu0 %v1724_v22  ;;  %1641 = vmatmul.mubr.bf16.gmra.mxu1 %v1725_v23 }
  0x45   : > { %1592 = vmatprep.mubr.bf16.mxu0 %v1726_v24  ;;  %1644 = vmatprep.mubr.bf16.mxu1 %v1727_v25 }
  0x4c   : > { %1593 = vmatmul.mubr.bf16.gmra.mxu0 %v1728_v26  ;;  %1645 = vmatmul.mubr.bf16.gmra.mxu1 %v1729_v27 }
  0x4d   : > { %1596 = vmatprep.mubr.bf16.mxu0 %v1730_v28  ;;  %1648 = vmatprep.mubr.bf16.mxu1 %v1731_v29 }
  0x54   : > { %1597 = vmatmul.mubr.bf16.gmra.mxu0 %v1732_v30  ;;  %1649 = vmatmul.mubr.bf16.gmra.mxu1 %v1733_v31 }
  0x55   : > { %1600 = vmatprep.mubr.bf16.mxu0 %v1734_v32  ;;  %1652 = vmatprep.mubr.bf16.mxu1 %v1735_v33 }
  0x5c   : > { %1601 = vmatmul.mubr.bf16.gmra.mxu0 %v1736_v34  ;;  %1653 = vmatmul.mubr.bf16.gmra.mxu1 %v1737_v35 }
  0x5d   : > { %1604 = vmatprep.mubr.bf16.mxu0 %v1738_v36  ;;  %1656 = vmatprep.mubr.bf16.mxu1 %v1739_v37 }
  0x64   : > { %1605 = vmatmul.mubr.bf16.gmra.mxu0 %v1740_v38  ;;  %1657 = vmatmul.mubr.bf16.gmra.mxu1 %v1741_v39 }
  0x65   : > { %1608 = vmatprep.mubr.bf16.mxu0 %v1742_v40  ;;  %1660 = vmatprep.mubr.bf16.mxu1 %v1743_v41 }
  0x6c   : > { %1609 = vmatmul.mubr.bf16.gmra.mxu0 %v1744_v42  ;;  %1661 = vmatmul.mubr.bf16.gmra.mxu1 %v1745_v43 }
  0x6d   : > { %1612 = vmatprep.mubr.bf16.mxu0 %v1746_v44  ;;  %1664 = vmatprep.mubr.bf16.mxu1 %v1747_v45 }
  0x74   : > { %1613 = vmatmul.mubr.bf16.gmra.mxu0 %v1748_v46  ;;  %1665 = vmatmul.mubr.bf16.gmra.mxu1 %v1749_v47 }
  0x75   : > { %1616 = vmatprep.mubr.bf16.mxu0 %v1750_v48  ;;  %1668 = vmatprep.mubr.bf16.mxu1 %v1751_v49 }
  0x7c   : > { %1617 = vmatmul.mubr.bf16.gmra.mxu0 %v1752_v50  ;;  %1669 = vmatmul.mubr.bf16.gmra.mxu1 %v1753_v51 }
  0x7d   : > { %1620 = vmatprep.mubr.bf16.mxu0 %v1754_v52  ;;  %1672 = vmatprep.mubr.bf16.mxu1 %v1755_v53  ;;  %v1979_v52 = vld [vmem:[%s2115_s2] ss:$0 sm:$0xff] }
  0x84   : > { %1621 = vmatmul.mubr.bf16.gmra.mxu0 %v1756_v54  ;;  %1673 = vmatmul.mubr.bf16.gmra.mxu1 %v1757_v55 }
  0x85   : > { %1624 = vmatprep.mubr.bf16.mxu0 %v1758_v56 }
  0x8c   : > { %1625 = vmatmul.mubr.bf16.gmra.mxu0 %v1759_v57 }
  0xec   : > { %v1578_v58 = vpop.f32.mrf.mxu0  ;;  %v1878_v59 = vpop.f32.mrf.mxu1 }
  0xee   : > { %v1880_v60 = vpop.f32.mrf.mxu0  ;;  %v878_v61 = vpop.f32.mrf.mxu1 }
  0xf0   : > { %v1882_v62 = vpop.f32.mrf.mxu0  ;;  %v1884_v63 = vpop.f32.mrf.mxu1 }
  0xf2   : > { %v1886_v0 = vpop.f32.mrf.mxu0  ;;  %v1888_v1 = vpop.f32.mrf.mxu1 }
  0xf3   : > { %2117 = vst [vmem:[#allocation2_spill] sm:$0xff] %v1886_v0 }
  0xf4   : > { %v1890_v2 = vpop.f32.mrf.mxu0  ;;  %v1892_v3 = vpop.f32.mrf.mxu1 }
  0xf6   : > { %v1894_v4 = vpop.f32.mrf.mxu0  ;;  %v1896_v5 = vpop.f32.mrf.mxu1 }
  0xf8   : > { %v1898_v6 = vpop.f32.mrf.mxu0  ;;  %v1900_v7 = vpop.f32.mrf.mxu1 }
  0xfa   : > { %v689_v8 = vpop.f32.mrf.mxu0  ;;  %v1902_v9 = vpop.f32.mrf.mxu1 }
  0xfc   : > { %v1904_v10 = vpop.f32.mrf.mxu0  ;;  %v1906_v11 = vpop.f32.mrf.mxu1 }
  0xfe   : > { %v1908_v12 = vpop.f32.mrf.mxu0  ;;  %v1910_v13 = vpop.f32.mrf.mxu1 }
 0x100   : > { %v1912_v14 = vpop.f32.mrf.mxu0  ;;  %v1914_v15 = vpop.f32.mrf.mxu1 }
 0x102   : > { %v1916_v16 = vpop.f32.mrf.mxu0  ;;  %v1918_v17 = vpop.f32.mrf.mxu1 }
 0x104   : > { %v1920_v18 = vpop.f32.mrf.mxu0  ;;  %v1922_v19 = vpop.f32.mrf.mxu1 }
 0x106   : > { %v1924_v20 = vpop.f32.mrf.mxu0  ;;  %v1926_v21 = vpop.f32.mrf.mxu1 }
 0x108   : > { %v1928_v22 = vpop.f32.mrf.mxu0  ;;  %v1930_v23 = vpop.f32.mrf.mxu1 }
 0x10a   : > { %v1932_v24 = vpop.f32.mrf.mxu0  ;;  %v1934_v25 = vpop.f32.mrf.mxu1 }
 0x10c   : > { %v1936_v26 = vpop.f32.mrf.mxu0  ;;  %v1938_v27 = vpop.f32.mrf.mxu1 }
 0x10e   : > { %v1940_v28 = vpop.f32.mrf.mxu0  ;;  %v1942_v29 = vpop.f32.mrf.mxu1 }
 0x110   : > { %v1944_v30 = vpop.f32.mrf.mxu0  ;;  %v1946_v31 = vpop.f32.mrf.mxu1 }
 0x112   : > { %v1948_v32 = vpop.f32.mrf.mxu0  ;;  %v1950_v33 = vpop.f32.mrf.mxu1 }
 0x114   : > { %v1952_v34 = vpop.f32.mrf.mxu0  ;;  %v1954_v35 = vpop.f32.mrf.mxu1 }
 0x115   : > { %2118 = vst [vmem:[#allocation3_spill] sm:$0xff] %v1954_v35 }
 0x116   : > { %v1956_v36 = vpop.f32.mrf.mxu0  ;;  %v1958_v37 = vpop.f32.mrf.mxu1 }
 0x118   : > { %v1960_v38 = vpop.f32.mrf.mxu0  ;;  %v1962_v39 = vpop.f32.mrf.mxu1 }
 0x119   : > { %2119 = vst [vmem:[#allocation4_spill] sm:$0xff] %v1960_v38 }
 0x11a   : > { %v1964_v40 = vpop.f32.mrf.mxu0  ;;  %v1966_v41 = vpop.f32.mrf.mxu1 }
 0x11b   : > { %2120 = vst [vmem:[#allocation5_spill] sm:$0xff] %v1966_v41 }
 0x11c   : > { %v1968_v42 = vpop.f32.mrf.mxu0  ;;  %v1654_v43 = vpop.f32.mrf.mxu1 }
 0x11d   : > { %2121 = vst [vmem:[#allocation6_spill] sm:$0xff] %v1968_v42  ;;  %v1097_v56 = vmax.f32 %v1888_v1, %v1654_v43 }
 0x11e   : > { %v1970_v44 = vpop.f32.mrf.mxu0  ;;  %v1972_v45 = vpop.f32.mrf.mxu1 }
 0x11f   : > { %2122 = vst [vmem:[#allocation7_spill] sm:$0xff] %v1970_v44  ;;  %2123 = vst [vmem:[#allocation8_spill] sm:$0xff] %v1972_v45 }
 0x120   : > { %v1603_v46 = vpop.f32.mrf.mxu0  ;;  %v1655_v47 = vpop.f32.mrf.mxu1 }
 0x121   : > { %v1071_v50 = vmax.f32 %v1578_v58, %v1603_v46  ;;  %v1098_v42 = vmax.f32 %v1878_v59, %v1655_v47 }
 0x122   : > { %v1974_v48 = vpop.f32.mrf.mxu0  ;;  %v977_v49 = vpop.f32.mrf.mxu1 }
 0x123   : > { %v1096_v51 = vmax.f32 %v878_v61, %v977_v49 }
 0x124   : > { %v1606_v53 = vpop.f32.mrf.mxu0  ;;  %v1658_v54 = vpop.f32.mrf.mxu1 }
 0x125   : > { %v1121_v55 = vmax.f32 %v1071_v50, %v1096_v51  ;;  %v1074_v45 = vmax.f32 %v689_v8, %v1606_v53  ;;  %v1101_v53 = vmax.f32 %v1902_v9, %v1658_v54 }
 0x126   : > { %v782_v57 = vpop.f32.mrf.mxu0  ;;  %v990_v44 = vpop.f32.mrf.mxu1 }
 0x127   : > { %v1153_v35 = vadd.f32 %v1979_v52, %v1121_v55  ;;  %v1072_v38 = vmax.f32 %v1882_v62, %v782_v57  ;;  %v1099_v58 = vmax.f32 %v1884_v63, %v990_v44 }
 0x128   : > { %v1607_v61 = vpop.f32.mrf.mxu0  ;;  %v1659_v46 = vpop.f32.mrf.mxu1 }
 0x129   : > { %v1178_v49 = vmax.f32 %v1153_v35, 0.0  ;;  %v1122_v41 = vmax.f32 %v1072_v38, %v1097_v56  ;;  %v1124_v0 = vmax.f32 %v1074_v45, %v1099_v58  ;;  %v1075_v38 = vmax.f32 %v1890_v2, %v1607_v61 }
 0x12a   : > { %v785_v1 = vpop.f32.mrf.mxu0  ;;  %v993_v8 = vpop.f32.mrf.mxu1  ;;  %v1102_v54 = vmax.f32 %v1892_v3, %v1659_v46 }
 0x12b   : > { %v1479_v43 = vpack.c.bf16 %v1178_v49, %v1178_v49  ;;  %v1154_v62 = vadd.f32 %v1979_v52, %v1122_v41  ;;  %v1156_v63 = vadd.f32 %v1979_v52, %v1124_v0  ;;  %v1073_v35 = vmax.f32 %v1894_v4, %v785_v1 }
 0x12c   : > { %v1100_v59 = vmax.f32 %v1896_v5, %v993_v8  ;;  %v1610_v44 = vpop.f32.mrf.mxu0  ;;  %v1662_v45 = vpop.f32.mrf.mxu1 }
 0x12d   : > { %1305 = vst.msk [vmem:[%s1990_s13 + $0x8] sm:$0xf] %vm1302_vm0, %v1479_v43  ;;  %v1179_v47 = vmax.f32 %v1154_v62, 0.0  ;;  %v1181_v50 = vmax.f32 %v1156_v63, 0.0  ;;  %v1123_v51 = vmax.f32 %v1073_v35, %v1098_v42  ;;  %v1078_v58 = vmax.f32 %v1916_v16, %v1610_v44 }
 0x12e   : > { %v1125_v41 = vmax.f32 %v1075_v38, %v1100_v59  ;;  %v798_v55 = vpop.f32.mrf.mxu0  ;;  %v1006_v0 = vpop.f32.mrf.mxu1 }
 0x12f   : > { %v1480_v56 = vpack.c.bf16 %v1179_v47, %v1179_v47  ;;  %v1482_v4 = vpack.c.bf16 %v1181_v50, %v1181_v50  ;;  %v1155_v2 = vadd.f32 %v1979_v52, %v1123_v51  ;;  %v1076_v5 = vmax.f32 %v1898_v6, %v798_v55 }
 0x130   : > { %v1157_v57 = vadd.f32 %v1979_v52, %v1125_v41  ;;  %v1103_v61 = vmax.f32 %v1900_v7, %v1006_v0  ;;  %v1611_v49 = vpop.f32.mrf.mxu0  ;;  %v1663_v1 = vpop.f32.mrf.mxu1  ;;  %v1105_v51 = vmax.f32 %v1918_v17, %v1662_v45 }
 0x131   : > { %1306 = vst.msk [vmem:[%s1990_s13 + $0xc] sm:$0xf] %vm1302_vm0, %v1480_v56  ;;  %1308 = vst.msk [vmem:[%s1990_s13 + $0x14] sm:$0xf] %vm1302_vm0, %v1482_v4  ;;  %v1180_v9 = vmax.f32 %v1155_v2, 0.0  ;;  %v1126_v42 = vmax.f32 %v1076_v5, %v1101_v53  ;;  %v1079_v6 = vmax.f32 %v1904_v10, %v1611_v49  ;;  %v1106_v49 = vmax.f32 %v1906_v11, %v1663_v1 }
 0x132   : > { %v1182_v8 = vmax.f32 %v1157_v57, 0.0  ;;  %v1128_v43 = vmax.f32 %v1078_v58, %v1103_v61  ;;  %v801_v62 = vpop.f32.mrf.mxu0  ;;  %v1009_v16 = vpop.f32.mrf.mxu1 }
 0x133   : > { %v1481_v63 = vpack.c.bf16 %v1180_v9, %v1180_v9  ;;  %v1158_v7 = vadd.f32 %v1979_v52, %v1126_v42  ;;  %v1077_v35 = vmax.f32 %v1908_v12, %v801_v62  ;;  %v1104_v38 = vmax.f32 %v1910_v13, %v1009_v16 }
 0x134   : > { %v1483_v59 = vpack.c.bf16 %v1182_v8, %v1182_v8  ;;  %v1160_v44 = vadd.f32 %v1979_v52, %v1128_v43  ;;  %v1614_v47 = vpop.f32.mrf.mxu0  ;;  %v1666_v50 = vpop.f32.mrf.mxu1 }
 0x135   : > { %1307 = vst.msk [vmem:[%s1990_s13 + $0x10] sm:$0xf] %vm1302_vm0, %v1481_v63  ;;  %v1183_v3 = vmax.f32 %v1158_v7, 0.0  ;;  %v1127_v46 = vmax.f32 %v1077_v35, %v1102_v54  ;;  %v1129_v10 = vmax.f32 %v1079_v6, %v1104_v38  ;;  %v1082_v2 = vmax.f32 %v1932_v24, %v1614_v47 }
 0x136   : > { %1309 = vst.msk [vmem:[%s1990_s13 + $0x18] sm:$0xf] %vm1302_vm0, %v1483_v59  ;;  %v1185_v53 = vmax.f32 %v1160_v44, 0.0  ;;  %v814_v12 = vpop.f32.mrf.mxu0  ;;  %v1022_v41 = vpop.f32.mrf.mxu1  ;;  %v1109_v7 = vmax.f32 %v1934_v25, %v1666_v50 }
 0x137   : > { %v1484_v13 = vpack.c.bf16 %v1183_v3, %v1183_v3  ;;  %v1159_v55 = vadd.f32 %v1979_v52, %v1127_v46  ;;  %v1161_v0 = vadd.f32 %v1979_v52, %v1129_v10  ;;  %v1080_v56 = vmax.f32 %v1912_v14, %v814_v12 }
 0x138   : > { %v1486_v4 = vpack.c.bf16 %v1185_v53, %v1185_v53  ;;  %v1107_v5 = vmax.f32 %v1914_v15, %v1022_v41  ;;  %v1615_v57 = vpop.f32.mrf.mxu0  ;;  %v1667_v58 = vpop.f32.mrf.mxu1 }
 0x139   : > { %1310 = vst.msk [vmem:[%s1990_s13 + $0x1c] sm:$0xf] %vm1302_vm0, %v1484_v13  ;;  %v1184_v17 = vmax.f32 %v1159_v55, 0.0  ;;  %v1186_v45 = vmax.f32 %v1161_v0, 0.0  ;;  %v1130_v61 = vmax.f32 %v1080_v56, %v1105_v51  ;;  %v1083_v6 = vmax.f32 %v1920_v18, %v1615_v57 }
 0x13a   : > { %1312 = vst.msk [vmem:[%s1990_s13 + $0x24] sm:$0xf] %vm1302_vm0, %v1486_v4  ;;  %v1132_v9 = vmax.f32 %v1082_v2, %v1107_v5  ;;  %v817_v14 = vpop.f32.mrf.mxu0  ;;  %v1025_v42 = vpop.f32.mrf.mxu1  ;;  %v1110_v12 = vmax.f32 %v1922_v19, %v1667_v58 }
 0x13b   : > { %v1485_v54 = vpack.c.bf16 %v1184_v17, %v1184_v17  ;;  %v1487_v24 = vpack.c.bf16 %v1186_v45, %v1186_v45  ;;  %v1162_v15 = vadd.f32 %v1979_v52, %v1130_v61  ;;  %v1081_v8 = vmax.f32 %v1924_v20, %v817_v14 }
 0x13c   : > { %v1164_v43 = vadd.f32 %v1979_v52, %v1132_v9  ;;  %v1108_v62 = vmax.f32 %v1926_v21, %v1025_v42  ;;  %v1618_v16 = vpop.f32.mrf.mxu0  ;;  %v1670_v63 = vpop.f32.mrf.mxu1 }
 0x13d   : > { %1311 = vst.msk [vmem:[%s1990_s13 + $0x20] sm:$0xf] %vm1302_vm0, %v1485_v54  ;;  %1313 = vst.msk [vmem:[%s1990_s13 + $0x28] sm:$0xf] %vm1302_vm0, %v1487_v24  ;;  %v1187_v11 = vmax.f32 %v1162_v15, 0.0  ;;  %v1131_v1 = vmax.f32 %v1081_v8, %v1106_v49  ;;  %v1086_v20 = vmax.f32 %v1948_v32, %v1618_v16  ;;  %v1113_v61 = vmax.f32 %v1950_v33, %v1670_v63 }
 0x13e   : > { %v1189_v35 = vmax.f32 %v1164_v43, 0.0  ;;  %v1133_v38 = vmax.f32 %v1083_v6, %v1108_v62  ;;  %v830_v59 = vpop.f32.mrf.mxu0  ;;  %v1038_v18 = vpop.f32.mrf.mxu1 }
 0x13f   : > { %v1488_v44 = vpack.c.bf16 %v1187_v11, %v1187_v11  ;;  %v1163_v21 = vadd.f32 %v1979_v52, %v1131_v1  ;;  %v1084_v47 = vmax.f32 %v1928_v22, %v830_v59  ;;  %v1111_v3 = vmax.f32 %v1930_v23, %v1038_v18 }
 0x140   : > { %v1490_v46 = vpack.c.bf16 %v1189_v35, %v1189_v35  ;;  %v1165_v10 = vadd.f32 %v1979_v52, %v1133_v38  ;;  %v1619_v51 = vpop.f32.mrf.mxu0  ;;  %v1671_v53 = vpop.f32.mrf.mxu1  ;;  %v1069_v38 = vmax.f32 %v1880_v60, %v1974_v48 }
 0x141   : > { %1314 = vst.msk [vmem:[%s1990_s13 + $0x2c] sm:$0xf] %vm1302_vm0, %v1488_v44  ;;  %v1188_v25 = vmax.f32 %v1163_v21, 0.0  ;;  %v1134_v50 = vmax.f32 %v1084_v47, %v1109_v7  ;;  %v1136_v32 = vmax.f32 %v1086_v20, %v1111_v3  ;;  %v1087_v2 = vmax.f32 %v1936_v26, %v1619_v51 }
 0x142   : > { %1316 = vst.msk [vmem:[%s1990_s13 + $0x34] sm:$0xf] %vm1302_vm0, %v1490_v46  ;;  %v1190_v41 = vmax.f32 %v1165_v10, 0.0  ;;  %v833_v22 = vpop.f32.mrf.mxu0  ;;  %v1041_v13 = vpop.f32.mrf.mxu1  ;;  %v1114_v62 = vmax.f32 %v1938_v27, %v1671_v53  ;;  %v2124_v46 = vld [vmem:[#allocation6_spill] sm:$0xff]  ;;  %v2126_v53 = vld [vmem:[#allocation5_spill] sm:$0xff] }
 0x143   : > { %v1489_v23 = vpack.c.bf16 %v1188_v25, %v1188_v25  ;;  %v1166_v55 = vadd.f32 %v1979_v52, %v1134_v50  ;;  %v1168_v0 = vadd.f32 %v1979_v52, %v1136_v32  ;;  %v1085_v56 = vmax.f32 %v1940_v28, %v833_v22  ;;  %v2125_v10 = vld [vmem:[#allocation2_spill] sm:$0xff]  ;;  %v2127_v32 = vld [vmem:[#allocation4_spill] sm:$0xff] }
 0x144   : > { %v1491_v4 = vpack.c.bf16 %v1190_v41, %v1190_v41  ;;  %v1112_v5 = vmax.f32 %v1942_v29, %v1041_v13  ;;  %v1622_v57 = vpop.f32.mrf.mxu0  ;;  %v1674_v17 = vpop.f32.mrf.mxu1  ;;  %v1070_v51 = vmax.f32 %v2125_v10, %v2124_v46 }
 0x145   : > { %1315 = vst.msk [vmem:[%s1990_s13 + $0x30] sm:$0xf] %vm1302_vm0, %v1489_v23  ;;  %v1191_v19 = vmax.f32 %v1166_v55, 0.0  ;;  %v1193_v58 = vmax.f32 %v1168_v0, 0.0  ;;  %v1135_v45 = vmax.f32 %v1085_v56, %v1110_v12  ;;  %v1090_v24 = vmax.f32 %v1964_v40, %v1622_v57  ;;  %v2128_v23 = vld [vmem:[#allocation8_spill] sm:$0xff] }
 0x146   : > { %1317 = vst.msk [vmem:[%s1990_s13 + $0x38] sm:$0xf] %vm1302_vm0, %v1491_v4  ;;  %v1137_v49 = vmax.f32 %v1087_v2, %v1112_v5  ;;  %v846_v28 = vpop.f32.mrf.mxu0  ;;  %v1054_v9 = vpop.f32.mrf.mxu1  ;;  %v1117_v25 = vmax.f32 %v2126_v53, %v1674_v17  ;;  %v2129_v17 = vld [vmem:[#allocation3_spill] sm:$0xff] }
 0x147   : > { %v1492_v14 = vpack.c.bf16 %v1191_v19, %v1191_v19  ;;  %v1494_v26 = vpack.c.bf16 %v1193_v58, %v1193_v58  ;;  %v1167_v29 = vadd.f32 %v1979_v52, %v1135_v45  ;;  %v1088_v42 = vmax.f32 %v1944_v30, %v846_v28  ;;  %v2130_v45 = vld [vmem:[#allocation7_spill] sm:$0xff] }
 0x148   : > { %v1169_v54 = vadd.f32 %v1979_v52, %v1137_v49  ;;  %v1115_v15 = vmax.f32 %v1946_v31, %v1054_v9  ;;  %v1623_v8 = vpop.f32.mrf.mxu0  ;;  %v1675_v43 = vpop.f32.mrf.mxu1 }
 0x149   : > { %1318 = vst.msk [vmem:[%s1990_s13 + $0x3c] sm:$0xf] %vm1302_vm0, %v1492_v14  ;;  %1320 = vst.msk [vmem:[%s1990_s13 + $0x44] sm:$0xf] %vm1302_vm0, %v1494_v26  ;;  %v1192_v33 = vmax.f32 %v1167_v29, 0.0  ;;  %v1138_v6 = vmax.f32 %v1088_v42, %v1113_v61  ;;  %v1091_v30 = vmax.f32 %v1952_v34, %v1623_v8  ;;  %v1118_v19 = vmax.f32 %v2129_v17, %v1675_v43 }
 0x14a   : > { %v1194_v16 = vmax.f32 %v1169_v54, 0.0  ;;  %v1140_v63 = vmax.f32 %v1090_v24, %v1115_v15  ;;  %v849_v11 = vpop.f32.mrf.mxu0  ;;  %v1057_v40 = vpop.f32.mrf.mxu1 }
 0x14b   : > { %v1493_v1 = vpack.c.bf16 %v1192_v33, %v1192_v33  ;;  %v1170_v31 = vadd.f32 %v1979_v52, %v1138_v6  ;;  %v1089_v7 = vmax.f32 %v1956_v36, %v849_v11  ;;  %v1116_v35 = vmax.f32 %v1958_v37, %v1057_v40 }
 0x14c   : > { %v1495_v20 = vpack.c.bf16 %v1194_v16, %v1194_v16  ;;  %v1172_v27 = vadd.f32 %v1979_v52, %v1140_v63  ;;  %v1626_v59 = vpop.f32.mrf.mxu0 }
 0x14d   : > { %1319 = vst.msk [vmem:[%s1990_s13 + $0x40] sm:$0xf] %vm1302_vm0, %v1493_v1  ;;  %v1195_v34 = vmax.f32 %v1170_v31, 0.0  ;;  %v1139_v18 = vmax.f32 %v1089_v7, %v1114_v62  ;;  %v1141_v44 = vmax.f32 %v1091_v30, %v1116_v35  ;;  %v1094_v21 = vmax.f32 %v1626_v59, %v1962_v39 }
 0x14e   : > { %1321 = vst.msk [vmem:[%s1990_s13 + $0x48] sm:$0xf] %vm1302_vm0, %v1495_v20  ;;  %v1197_v36 = vmax.f32 %v1172_v27, 0.0  ;;  %v862_v37 = vpop.f32.mrf.mxu0 }
 0x14f   : > { %v1496_v47 = vpack.c.bf16 %v1195_v34, %v1195_v34  ;;  %v1171_v60 = vadd.f32 %v1979_v52, %v1139_v18  ;;  %v1173_v48 = vadd.f32 %v1979_v52, %v1141_v44  ;;  %v1119_v3 = vmax.f32 %v1069_v38, %v1094_v21 }
 0x150   : > { %v1498_v50 = vpack.c.bf16 %v1197_v36, %v1197_v36  ;;  %v1092_v12 = vmax.f32 %v2127_v32, %v862_v37  ;;  %v1627_v39 = vpop.f32.mrf.mxu0 }
 0x151   : > { %1322 = vst.msk [vmem:[%s1990_s13 + $0x4c] sm:$0xf] %vm1302_vm0, %v1496_v47  ;;  %v1196_v41 = vmax.f32 %v1171_v60, 0.0  ;;  %v1198_v22 = vmax.f32 %v1173_v48, 0.0  ;;  %v1151_v13 = vadd.f32 %v1979_v52, %v1119_v3  ;;  %v1095_v55 = vmax.f32 %v1627_v39, %v2128_v23 }
 0x152   : > { %1324 = vst.msk [vmem:[%s1990_s13 + $0x54] sm:$0xf] %vm1302_vm0, %v1498_v50  ;;  %v1142_v0 = vmax.f32 %v1092_v12, %v1117_v25  ;;  %v865_v56 = vpop.f32.mrf.mxu0 }
 0x153   : > { %v1497_v4 = vpack.c.bf16 %v1196_v41, %v1196_v41  ;;  %v1499_v2 = vpack.c.bf16 %v1198_v22, %v1198_v22  ;;  %v1176_v5 = vmax.f32 %v1151_v13, 0.0  ;;  %v1120_v57 = vmax.f32 %v1070_v51, %v1095_v55 }
 0x154   : > { %v1174_v58 = vadd.f32 %v1979_v52, %v1142_v0  ;;  %v1093_v61 = vmax.f32 %v2130_v45, %v865_v56 }
 0x155   : > { %1323 = vst.msk [vmem:[%s1990_s13 + $0x50] sm:$0xf] %vm1302_vm0, %v1497_v4  ;;  %1325 = vst.msk [vmem:[%s1990_s13 + $0x58] sm:$0xf] %vm1302_vm0, %v1499_v2  ;;  %v1477_v49 = vpack.c.bf16 %v1176_v5, %v1176_v5  ;;  %v1152_v28 = vadd.f32 %v1979_v52, %v1120_v57 }
 0x156   : > { %v1199_v9 = vmax.f32 %v1174_v58, 0.0  ;;  %v1143_v14 = vmax.f32 %v1093_v61, %v1118_v19 }
 0x157   : > { %1303 = vst.msk [vmem:[%s1990_s13] sm:$0xf] %vm1302_vm0, %v1477_v49  ;;  %v1177_v26 = vmax.f32 %v1152_v28, 0.0 }
 0x158   : > { %v1500_v29 = vpack.c.bf16 %v1199_v9, %v1199_v9  ;;  %v1175_v42 = vadd.f32 %v1979_v52, %v1143_v14 }
 0x159   : > { %v1478_v54 = vpack.c.bf16 %v1177_v26, %v1177_v26 }
 0x15a   : > { %1326 = vst.msk [vmem:[%s1990_s13 + $0x5c] sm:$0xf] %vm1302_vm0, %v1500_v29  ;;  %v1200_v24 = vmax.f32 %v1175_v42, 0.0 }
 0x15b   : > { %1304 = vst.msk [vmem:[%s1990_s13 + $0x4] sm:$0xf] %vm1302_vm0, %v1478_v54 }
 0x15c   : > { %v1501_v15 = vpack.c.bf16 %v1200_v24, %v1200_v24 }
 0x15e   : > { %1328 = vst.msk [vmem:[%s1990_s13 + $0x60] sm:$0x3] %vm1327_vm1, %v1501_v15 }
 0x15f PF: > { %s13_s12 = sadd.s32 1, %s1766_s12  }
 0x160   : > { %p10_p4 = scmp.ge.s32.totalorder %s13_s12, 4  }
 0x162   :  { %12 = sbr.rel (!%p10_p4) target bundleno = 1 (0x1), region = 62 }

// kernel: lenet_forward.4
= control target key start
LH: loop header
LB: loop body
LE: loop exit
PB: predicated region body
PF: predicated region fallthrough
CT: control target
= control target key end

     0   :  { %s1249_s12 = smov 0   ;;  %s1447_s0 = inlined_call_operand.vmem [shape: bf16[2,128,512], index: 0, kind: input, shape index: {}]   ;;  %s1448_s1 = inlined_call_operand.vmem [shape: bf16[512,128], index: 1, kind: input, shape index: {}]   ;;  %s1449_s2 = inlined_call_operand.vmem [shape: f32[1,128], index: 2, kind: input, shape index: {}]   ;;  %s1450_s3 = inlined_call_operand.vmem [shape: bf16[2,32,32], index: 3, kind: output, shape index: {}]  }
   0x1 LB: > { %s921_s13 = sadd.s32 4294967295, %s1227_s12   ;;  %p925_p0 = scmp.ge.s32.totalorder %s1227_s12, 1  ;;  %s1227_s12 = sphi %s1249_s12, %s13_s12  }
   0x2   : > { %p137_p1 = scmp.lt.s32.totalorder %s1227_s12, 3 }
   0x4   : > { %p138_p2 = pnand %p925_p0, %p137_p1 }
   0x6   : > { %141 = sbr.rel (%p138_p2) target bundleno = 319 (0x13f), region = 32 }
   0xb   : > { %v1141_v0 = vld [vmem:[%s1448_s1 + $0x78] sm:$0xff]   ;;  %v1145_v4 = vld [vmem:[%s1448_s1 + $0x70] sm:$0xff]   ;;  %v1149_v8 = vld [vmem:[%s1448_s1 + $0x68] sm:$0xff]   ;;  %p161_p3 = scmp.lt.s32.totalorder %s921_s13, 1  ;;  %vm861_vm0 = vcmask 257024   ;;  %vm843_vm1 = vcmask 1044480  }
   0xc   : > { %v1142_v1 = vld [vmem:[%s1448_s1 + $0xf8] sm:$0xff]   ;;  %1005 = vmatprep.subr.bf16.mxu0 %v1141_v0  ;;  %v1146_v5 = vld [vmem:[%s1448_s1 + $0xf0] sm:$0xff]   ;;  %v1150_v9 = vld [vmem:[%s1448_s1 + $0xe8] sm:$0xff]   ;;  %vm844_vm2 = vsmask.f32 4352 }
   0xd   : > { %v1143_v2 = vld [vmem:[%s1448_s1 + $0x38] sm:$0xff]   ;;  %1069 = vmatprep.subr.bf16.mxu1 %v1142_v1  ;;  %v1147_v6 = vld [vmem:[%s1448_s1 + $0x30] sm:$0xff]   ;;  %v1151_v10 = vld [vmem:[%s1448_s1 + $0x28] sm:$0xff]   ;;  %s1458_s13 = smov (!%p161_p3, %s921_s13), 1 }
   0xe   : > { %v1144_v3 = vld [vmem:[%s1448_s1 + $0xb8] sm:$0xff]   ;;  %1006 = vmatpush3.bf16.msra.mxu0 %v1143_v2  ;;  %v1148_v7 = vld [vmem:[%s1448_s1 + $0xb0] sm:$0xff]   ;;  %v1152_v11 = vld [vmem:[%s1448_s1 + $0xa8] sm:$0xff]   ;;  %s1001_s18 = sshll.u32 %s1458_s13, 8  ;;  %s1002_s7 = sshll.u32 %s1458_s13, 4 }
   0xf   : > { %1070 = vmatpush3.bf16.msra.mxu1 %v1144_v3  ;;  %1007 = vmatprep.subr.bf16.mxu0 %v1145_v4  ;;  %v1153_v12 = vld [vmem:[%s1448_s1 + $0x60] sm:$0xff]   ;;  %v1157_v16 = vld [vmem:[%s1448_s1 + $0x58] sm:$0xff]   ;;  %v1161_v20 = vld [vmem:[%s1448_s1 + $0x50] sm:$0xff]   ;;  %s1357_s27 = scalar_lea.vmem %s1447_s0, %s1001_s18  ;;  %s1434_s9 = scalar_lea.vmem %s1450_s3, %s1002_s7 }
  0x10   : > { %1071 = vmatprep.subr.bf16.mxu1 %v1146_v5  ;;  %v1154_v13 = vld [vmem:[%s1448_s1 + $0xe0] sm:$0xff]   ;;  %v1158_v17 = vld [vmem:[%s1448_s1 + $0xd8] sm:$0xff]   ;;  %v1162_v21 = vld [vmem:[%s1448_s1 + $0xd0] sm:$0xff]  }
  0x11   : > { %v1155_v14 = vld [vmem:[%s1448_s1 + $0x20] sm:$0xff]   ;;  %v1159_v18 = vld [vmem:[%s1448_s1 + $0x18] sm:$0xff]   ;;  %v1163_v22 = vld [vmem:[%s1448_s1 + $0x10] sm:$0xff]  }
  0x12   : > { %1008 = vmatpush3.bf16.msra.mxu0 %v1147_v6  ;;  %v1156_v15 = vld [vmem:[%s1448_s1 + $0xa0] sm:$0xff]   ;;  %v1160_v19 = vld [vmem:[%s1448_s1 + $0x98] sm:$0xff]   ;;  %v1164_v23 = vld [vmem:[%s1448_s1 + $0x90] sm:$0xff]  }
  0x13   : > { %1072 = vmatpush3.bf16.msra.mxu1 %v1148_v7  ;;  %1009 = vmatprep.subr.bf16.mxu0 %v1149_v8  ;;  %v1165_v24 = vld [vmem:[%s1448_s1 + $0x48] sm:$0xff]   ;;  %v1169_v28 = vld [vmem:[%s1448_s1 + $0x40] sm:$0xff]   ;;  %vm845_vm3 = vmand %vm843_vm1, %vm844_vm2 }
  0x14   : > { %1073 = vmatprep.subr.bf16.mxu1 %v1150_v9  ;;  %v1166_v25 = vld [vmem:[%s1448_s1 + $0xc8] sm:$0xff]   ;;  %v1170_v29 = vld [vmem:[%s1448_s1 + $0xc0] sm:$0xff]  }
  0x15   : > { %v1167_v26 = vld [vmem:[%s1448_s1 + $0x8] sm:$0xff]   ;;  %v1171_v30 = vld [vmem:[%s1448_s1] sm:$0xff]  }
  0x16   : > { %1010 = vmatpush3.bf16.msra.mxu0 %v1151_v10  ;;  %v1168_v27 = vld [vmem:[%s1448_s1 + $0x88] sm:$0xff]   ;;  %v1172_v31 = vld [vmem:[%s1448_s1 + $0x80] sm:$0xff]  }
  0x17   : > { %1074 = vmatpush3.bf16.msra.mxu1 %v1152_v11  ;;  %1011 = vmatprep.subr.bf16.mxu0 %v1153_v12  ;;  %v1173_v32 = vld [vmem:[%s1357_s27] ss:$16 sps:$4 sm:$0xff]   ;;  %v1175_v33 = vld [vmem:[%s1357_s27 + $0x4] ss:$16 sps:$4 sm:$0xff]   ;;  %v1176_v34 = vld [vmem:[%s1357_s27 + $0x8] ss:$16 sps:$4 sm:$0xff]  }
  0x18   : > { %1075 = vmatprep.subr.bf16.mxu1 %v1154_v13  ;;  %v1178_v35 = vld [vmem:[%s1357_s27 + $0xc] ss:$16 sps:$4 sm:$0xff]   ;;  %652 = vmatprep.mubr.bf16.mxu0 %v1175_v33  ;;  %v1179_v36 = vld [vmem:[%s1357_s27 + $0x24] ss:$16 sps:$4 sm:$0xff]   ;;  %v1183_v38 = vld [vmem:[%s1357_s27 + $0x20] ss:$16 sps:$4 sm:$0xff]  }
  0x19   : > { %749 = vmatprep.mubr.bf16.mxu1 %v1178_v35  ;;  %v1181_v37 = vld [vmem:[%s1357_s27 + $0x2c] ss:$16 sps:$4 sm:$0xff]   ;;  %v1184_v39 = vld [vmem:[%s1357_s27 + $0x28] ss:$16 sps:$4 sm:$0xff]   ;;  %v1185_v40 = vld [vmem:[%s1357_s27 + $0x44] ss:$16 sps:$4 sm:$0xff]  }
  0x1a   : > { %1012 = vmatpush3.bf16.msra.mxu0 %v1155_v14  ;;  %v1187_v41 = vld [vmem:[%s1357_s27 + $0x4c] ss:$16 sps:$4 sm:$0xff]   ;;  %v1189_v42 = vld [vmem:[%s1357_s27 + $0x40] ss:$16 sps:$4 sm:$0xff]   ;;  %v1190_v43 = vld [vmem:[%s1357_s27 + $0x48] ss:$16 sps:$4 sm:$0xff]  }
  0x1b   : > { %1076 = vmatpush3.bf16.msra.mxu1 %v1156_v15  ;;  %1013 = vmatprep.subr.bf16.mxu0 %v1157_v16  ;;  %v1191_v44 = vld [vmem:[%s1357_s27 + $0x64] ss:$16 sps:$4 sm:$0xff]   ;;  %v1193_v45 = vld [vmem:[%s1357_s27 + $0x6c] ss:$16 sps:$4 sm:$0xff]   ;;  %v1195_v46 = vld [vmem:[%s1357_s27 + $0x60] ss:$16 sps:$4 sm:$0xff]  }
  0x1c   : > { %1077 = vmatprep.subr.bf16.mxu1 %v1158_v17  ;;  %v1196_v47 = vld [vmem:[%s1357_s27 + $0x68] ss:$16 sps:$4 sm:$0xff]   ;;  %v1197_v48 = vld [vmem:[%s1357_s27 + $0x84] ss:$16 sps:$4 sm:$0xff]   ;;  %v1199_v49 = vld [vmem:[%s1357_s27 + $0x8c] ss:$16 sps:$4 sm:$0xff]  }
  0x1d   : > { %v1201_v50 = vld [vmem:[%s1357_s27 + $0x80] ss:$16 sps:$4 sm:$0xff]   ;;  %v1202_v51 = vld [vmem:[%s1357_s27 + $0x88] ss:$16 sps:$4 sm:$0xff]   ;;  %v1203_v52 = vld [vmem:[%s1357_s27 + $0xa4] ss:$16 sps:$4 sm:$0xff]  }
  0x1e   : > { %1014 = vmatpush3.bf16.msra.mxu0 %v1159_v18  ;;  %v1205_v53 = vld [vmem:[%s1357_s27 + $0xac] ss:$16 sps:$4 sm:$0xff]   ;;  %v1207_v54 = vld [vmem:[%s1357_s27 + $0xa0] ss:$16 sps:$4 sm:$0xff]   ;;  %v1208_v55 = vld [vmem:[%s1357_s27 + $0xa8] ss:$16 sps:$4 sm:$0xff]  }
  0x1f   : > { %1078 = vmatpush3.bf16.msra.mxu1 %v1160_v19  ;;  %1015 = vmatprep.subr.bf16.mxu0 %v1161_v20  ;;  %v1209_v56 = vld [vmem:[%s1357_s27 + $0xc4] ss:$16 sps:$4 sm:$0xff]   ;;  %v1211_v57 = vld [vmem:[%s1357_s27 + $0xcc] ss:$16 sps:$4 sm:$0xff]   ;;  %v1213_v58 = vld [vmem:[%s1357_s27 + $0xc0] ss:$16 sps:$4 sm:$0xff]  }
  0x20   : > { %1079 = vmatprep.subr.bf16.mxu1 %v1162_v21  ;;  %v1214_v59 = vld [vmem:[%s1357_s27 + $0xc8] ss:$16 sps:$4 sm:$0xff]   ;;  %v1215_v60 = vld [vmem:[%s1357_s27 + $0xe4] ss:$16 sps:$4 sm:$0xff]   ;;  %v1217_v61 = vld [vmem:[%s1357_s27 + $0xec] ss:$16 sps:$4 sm:$0xff]  }
  0x21   : > { %v1219_v62 = vld [vmem:[%s1357_s27 + $0xe0] ss:$16 sps:$4 sm:$0xff]   ;;  %v1220_v63 = vld [vmem:[%s1357_s27 + $0xe8] ss:$16 sps:$4 sm:$0xff]  }
  0x22   : > { %1016 = vmatpush3.bf16.msra.mxu0 %v1163_v22 }
  0x23   : > { %1080 = vmatpush3.bf16.msra.mxu1 %v1164_v23  ;;  %1017 = vmatprep.subr.bf16.mxu0 %v1165_v24 }
  0x24   : > { %1081 = vmatprep.subr.bf16.mxu1 %v1166_v25 }
  0x26   : > { %1018 = vmatpush3.bf16.msra.mxu0 %v1167_v26 }
  0x27   : > { %1082 = vmatpush3.bf16.msra.mxu1 %v1168_v27  ;;  %1019 = vmatprep.subr.bf16.mxu0 %v1169_v28 }
  0x28   : > { %1083 = vmatprep.subr.bf16.mxu1 %v1170_v29 }
  0x2a   : > { %1020 = vmatpush3.bf16.msra.mxu0 %v1171_v30 }
  0x2b   : > { %1084 = vmatpush3.bf16.msra.mxu1 %v1172_v31 }
  0x2d   : > { %653 = vmatmul.mubr.bf16.vlgmr.msra.gmra.mxu0 %v1173_v32 }
  0x2e   : > { %750 = vmatmul.mubr.bf16.vlgmr.msra.gmra.mxu1 %v1176_v34  ;;  %660 = vmatprep.mubr.bf16.mxu0 %v1179_v36 }
  0x2f   : > { %757 = vmatprep.mubr.bf16.mxu1 %v1181_v37 }
  0x35   : > { %661 = vmatmul.mubr.bf16.gmra.mxu0 %v1183_v38 }
  0x36   : > { %758 = vmatmul.mubr.bf16.gmra.mxu1 %v1184_v39  ;;  %668 = vmatprep.mubr.bf16.mxu0 %v1185_v40 }
  0x37   : > { %765 = vmatprep.mubr.bf16.mxu1 %v1187_v41 }
  0x3d   : > { %669 = vmatmul.mubr.bf16.gmra.mxu0 %v1189_v42 }
  0x3e   : > { %766 = vmatmul.mubr.bf16.gmra.mxu1 %v1190_v43  ;;  %676 = vmatprep.mubr.bf16.mxu0 %v1191_v44 }
  0x3f   : > { %773 = vmatprep.mubr.bf16.mxu1 %v1193_v45 }
  0x45   : > { %677 = vmatmul.mubr.bf16.gmra.mxu0 %v1195_v46 }
  0x46   : > { %774 = vmatmul.mubr.bf16.gmra.mxu1 %v1196_v47  ;;  %684 = vmatprep.mubr.bf16.mxu0 %v1197_v48 }
  0x47   : > { %781 = vmatprep.mubr.bf16.mxu1 %v1199_v49 }
  0x4d   : > { %685 = vmatmul.mubr.bf16.gmra.mxu0 %v1201_v50 }
  0x4e   : > { %782 = vmatmul.mubr.bf16.gmra.mxu1 %v1202_v51  ;;  %692 = vmatprep.mubr.bf16.mxu0 %v1203_v52 }
  0x4f   : > { %789 = vmatprep.mubr.bf16.mxu1 %v1205_v53 }
  0x55   : > { %693 = vmatmul.mubr.bf16.gmra.mxu0 %v1207_v54 }
  0x56   : > { %790 = vmatmul.mubr.bf16.gmra.mxu1 %v1208_v55  ;;  %700 = vmatprep.mubr.bf16.mxu0 %v1209_v56 }
  0x57   : > { %797 = vmatprep.mubr.bf16.mxu1 %v1211_v57 }
  0x5d   : > { %701 = vmatmul.mubr.bf16.gmra.mxu0 %v1213_v58 }
  0x5e   : > { %798 = vmatmul.mubr.bf16.gmra.mxu1 %v1214_v59  ;;  %708 = vmatprep.mubr.bf16.mxu0 %v1215_v60 }
  0x5f   : > { %805 = vmatprep.mubr.bf16.mxu1 %v1217_v61 }
  0x65   : > { %709 = vmatmul.mubr.bf16.gmra.mxu0 %v1219_v62 }
  0x66   : > { %806 = vmatmul.mubr.bf16.gmra.mxu1 %v1220_v63 }
  0xed   : > { %v1021_v0 = vpop.f32.mrf.mxu0 }
  0xee   : > { %v1085_v1 = vpop.f32.mrf.mxu1 }
  0xef   : > { %v1022_v2 = vpop.f32.mrf.mxu0 }
  0xf0   : > { %v1086_v3 = vpop.f32.mrf.mxu1  ;;  %v1023_v47 = vadd.f32 %v1022_v2, %v1021_v0 }
  0xf1   : > { %v1024_v4 = vpop.f32.mrf.mxu0  ;;  %v1087_v48 = vadd.f32 %v1086_v3, %v1085_v1 }
  0xf2   : > { %v1088_v5 = vpop.f32.mrf.mxu1 }
  0xf3   : > { %v1025_v6 = vpop.f32.mrf.mxu0  ;;  %v752_v57 = vadd.f32 %v1087_v48, %v1023_v47 }
  0xf4   : > { %v1089_v7 = vpop.f32.mrf.mxu1 }
  0xf5   : > { %v1027_v8 = vpop.f32.mrf.mxu0 }
  0xf6   : > { %v1091_v9 = vpop.f32.mrf.mxu1 }
  0xf7   : > { %v1028_v10 = vpop.f32.mrf.mxu0 }
  0xf8   : > { %v1092_v11 = vpop.f32.mrf.mxu1  ;;  %v1029_v0 = vadd.f32 %v1028_v10, %v1027_v8 }
  0xf9   : > { %v1397_v12 = vpop.f32.mrf.mxu0  ;;  %v1093_v1 = vadd.f32 %v1092_v11, %v1091_v9 }
  0xfa   : > { %v1399_v13 = vpop.f32.mrf.mxu1 }
  0xfb   : > { %v1401_v14 = vpop.f32.mrf.mxu0  ;;  %v760_v8 = vadd.f32 %v1093_v1, %v1029_v0 }
  0xfc   : > { %v1403_v15 = vpop.f32.mrf.mxu1 }
  0xfd   : > { %1451 = vst [vmem:[#allocation2_spill] sm:$0xff] %v1403_v15  ;;  %v1033_v16 = vpop.f32.mrf.mxu0  ;;  %v1090_v15 = vadd.f32 %v1089_v7, %v1088_v5 }
  0xfe   : > { %v1097_v17 = vpop.f32.mrf.mxu1 }
  0xff   : > { %v1034_v18 = vpop.f32.mrf.mxu0 }
 0x100   : > { %v1098_v19 = vpop.f32.mrf.mxu1  ;;  %v1035_v50 = vadd.f32 %v1034_v18, %v1033_v16 }
 0x101   : > { %v1036_v20 = vpop.f32.mrf.mxu0  ;;  %v1099_v51 = vadd.f32 %v1098_v19, %v1097_v17 }
 0x102   : > { %v1100_v21 = vpop.f32.mrf.mxu1 }
 0x103   : > { %v1037_v22 = vpop.f32.mrf.mxu0  ;;  %v768_v60 = vadd.f32 %v1099_v51, %v1035_v50 }
 0x104   : > { %v1101_v23 = vpop.f32.mrf.mxu1  ;;  %v1038_v61 = vadd.f32 %v1037_v22, %v1036_v20 }
 0x105   : > { %v1039_v24 = vpop.f32.mrf.mxu0  ;;  %v1102_v62 = vadd.f32 %v1101_v23, %v1100_v21  ;;  %v814_v47 = vmax.f32 %v752_v57, %v768_v60 }
 0x106   : > { %v1103_v25 = vpop.f32.mrf.mxu1 }
 0x107   : > { %v1040_v26 = vpop.f32.mrf.mxu0  ;;  %v771_v48 = vadd.f32 %v1102_v62, %v1038_v61 }
 0x108   : > { %v1104_v27 = vpop.f32.mrf.mxu1 }
 0x109   : > { %v1405_v28 = vpop.f32.mrf.mxu0 }
 0x10a   : > { %v1407_v29 = vpop.f32.mrf.mxu1 }
 0x10b   : > { %v1409_v30 = vpop.f32.mrf.mxu0 }
 0x10c   : > { %v1411_v31 = vpop.f32.mrf.mxu1 }
 0x10d   : > { %v1045_v32 = vpop.f32.mrf.mxu0 }
 0x10e   : > { %v1109_v33 = vpop.f32.mrf.mxu1 }
 0x10f   : > { %v1046_v34 = vpop.f32.mrf.mxu0 }
 0x110   : > { %v1110_v35 = vpop.f32.mrf.mxu1  ;;  %v1047_v54 = vadd.f32 %v1046_v34, %v1045_v32  ;;  %v1041_v32 = vadd.f32 %v1040_v26, %v1039_v24  ;;  %v1044_v26 = vadd.f32 %v1409_v30, %v1405_v28 }
 0x111   : > { %v1048_v36 = vpop.f32.mrf.mxu0  ;;  %v1111_v55 = vadd.f32 %v1110_v35, %v1109_v33  ;;  %v1105_v33 = vadd.f32 %v1104_v27, %v1103_v25 }
 0x112   : > { %v1112_v37 = vpop.f32.mrf.mxu1 }
 0x113   : > { %v1049_v38 = vpop.f32.mrf.mxu0  ;;  %v784_v3 = vadd.f32 %v1111_v55, %v1047_v54  ;;  %v776_v25 = vadd.f32 %v1105_v33, %v1041_v32 }
 0x114   : > { %v1113_v39 = vpop.f32.mrf.mxu1  ;;  %v1050_v16 = vadd.f32 %v1049_v38, %v1048_v36 }
 0x115   : > { %v1051_v40 = vpop.f32.mrf.mxu0  ;;  %v1114_v17 = vadd.f32 %v1113_v39, %v1112_v37  ;;  %v816_v55 = vmax.f32 %v760_v8, %v776_v25 }
 0x116   : > { %v1115_v41 = vpop.f32.mrf.mxu1 }
 0x117   : > { %v1052_v42 = vpop.f32.mrf.mxu0  ;;  %v787_v9 = vadd.f32 %v1114_v17, %v1050_v16 }
 0x118   : > { %v1116_v43 = vpop.f32.mrf.mxu1 }
 0x119   : > { %v1413_v44 = vpop.f32.mrf.mxu0  ;;  %v1117_v5 = vadd.f32 %v1116_v43, %v1115_v41  ;;  %v1454_v43 = vld [vmem:[#allocation2_spill] sm:$0xff] }
 0x11a   : > { %1452 = vst [vmem:[#allocation3_spill] sm:$0xff] %v1413_v44  ;;  %v1415_v45 = vpop.f32.mrf.mxu1 }
 0x11b   : > { %1453 = vst [vmem:[#allocation4_spill] sm:$0xff] %v1415_v45  ;;  %v1055_v46 = vpop.f32.mrf.mxu0  ;;  %v1026_v45 = vadd.f32 %v1025_v6, %v1024_v4  ;;  %v1053_v4 = vadd.f32 %v1052_v42, %v1051_v40  ;;  %v994_v6 = vld [vmem:[%s1449_s2] ss:$0 sm:$0xff]  ;;  %v1032_v42 = vadd.f32 %v1401_v14, %v1397_v12 }
 0x11c   : > { %v1119_v49 = vpop.f32.mrf.mxu1 }
 0x11d   : > { %v1057_v52 = vpop.f32.mrf.mxu0  ;;  %v755_v23 = vadd.f32 %v1090_v15, %v1026_v45  ;;  %v1108_v15 = vadd.f32 %v1411_v31, %v1407_v29  ;;  %v792_v45 = vadd.f32 %v1117_v5, %v1053_v4 }
 0x11e   : > { %v1121_v53 = vpop.f32.mrf.mxu1 }
 0x11f   : > { %v1058_v56 = vpop.f32.mrf.mxu0  ;;  %v815_v37 = vmax.f32 %v755_v23, %v771_v48 }
 0x120   : > { %v1059_v58 = vadd.f32 %v1058_v56, %v1057_v52  ;;  %v1122_v59 = vpop.f32.mrf.mxu1  ;;  %v779_v56 = vadd.f32 %v1108_v15, %v1044_v26 }
 0x121   : > { %v1123_v63 = vadd.f32 %v1122_v59, %v1121_v53  ;;  %v1060_v44 = vpop.f32.mrf.mxu0  ;;  %v1455_v50 = vld [vmem:[#allocation3_spill] sm:$0xff] }
 0x122   : > { %v1124_v2 = vpop.f32.mrf.mxu1  ;;  %v1056_v28 = vadd.f32 %v1055_v46, %v1455_v50  ;;  %v1456_v51 = vld [vmem:[#allocation4_spill] sm:$0xff] }
 0x123   : > { %v800_v18 = vadd.f32 %v1123_v63, %v1059_v58  ;;  %v1061_v19 = vpop.f32.mrf.mxu0  ;;  %v1120_v29 = vadd.f32 %v1119_v49, %v1456_v51 }
 0x124   : > { %v1062_v34 = vadd.f32 %v1061_v19, %v1060_v44  ;;  %v1125_v35 = vpop.f32.mrf.mxu1  ;;  %v1096_v44 = vadd.f32 %v1454_v43, %v1399_v13 }
 0x125   : > { %v818_v20 = vmax.f32 %v784_v3, %v800_v18  ;;  %v1126_v21 = vadd.f32 %v1125_v35, %v1124_v2  ;;  %v1063_v22 = vpop.f32.mrf.mxu0  ;;  %v795_v59 = vadd.f32 %v1120_v29, %v1056_v28 }
 0x126   : > { %v1127_v7 = vpop.f32.mrf.mxu1  ;;  %v763_v58 = vadd.f32 %v1096_v44, %v1032_v42 }
 0x127   : > { %v822_v10 = vmax.f32 %v814_v47, %v818_v20  ;;  %v803_v11 = vadd.f32 %v1126_v21, %v1062_v34  ;;  %v1064_v24 = vpop.f32.mrf.mxu0 }
 0x128   : > { %v1065_v27 = vadd.f32 %v1064_v24, %v1063_v22  ;;  %v1128_v36 = vpop.f32.mrf.mxu1  ;;  %v817_v63 = vmax.f32 %v763_v58, %v779_v56 }
 0x129   : > { %v833_v38 = vadd.f32 %v994_v6, %v822_v10  ;;  %v819_v39 = vmax.f32 %v787_v9, %v803_v11  ;;  %v1129_v40 = vadd.f32 %v1128_v36, %v1127_v7  ;;  %v1066_v41 = vpop.f32.mrf.mxu0 }
 0x12a   : > { %v1130_v30 = vpop.f32.mrf.mxu1 }
 0x12b   : > { %v837_v31 = vmax.f32 %v833_v38, 0.0  ;;  %v823_v52 = vmax.f32 %v815_v37, %v819_v39  ;;  %v808_v53 = vadd.f32 %v1129_v40, %v1065_v27  ;;  %v1067_v54 = vpop.f32.mrf.mxu0 }
 0x12c   : > { %v1068_v12 = vadd.f32 %v1067_v54, %v1066_v41  ;;  %v1131_v13 = vpop.f32.mrf.mxu1 }
 0x12d   : > { %v1003_v14 = vpack.c.bf16 %v837_v31, %v837_v31  ;;  %v834_v46 = vadd.f32 %v994_v6, %v823_v52  ;;  %v820_v57 = vmax.f32 %v792_v45, %v808_v53  ;;  %v1132_v49 = vadd.f32 %v1131_v13, %v1130_v30 }
 0x12f   : > { %862 = vst.msk [vmem:[%s1434_s9] sm:$0xf] %vm861_vm0, %v1003_v14  ;;  %v838_v60 = vmax.f32 %v834_v46, 0.0  ;;  %v824_v61 = vmax.f32 %v816_v55, %v820_v57  ;;  %v811_v62 = vadd.f32 %v1132_v49, %v1068_v12 }
 0x131   : > { %v1004_v0 = vpack.c.bf16 %v838_v60, %v838_v60  ;;  %v821_v1 = vmax.f32 %v795_v59, %v811_v62  ;;  %v835_v2 = vadd.f32 %v994_v6, %v824_v61 }
 0x133   : > { %863 = vst.msk [vmem:[%s1434_s9 + $0x4] sm:$0xf] %vm861_vm0, %v1004_v0  ;;  %v825_v3 = vmax.f32 %v817_v63, %v821_v1  ;;  %v839_v17 = vmax.f32 %v835_v2, 0.0 }
 0x135   : > { %v836_v16 = vadd.f32 %v994_v6, %v825_v3 }
 0x137   : > { %v840_v18 = vmax.f32 %v836_v16, 0.0 }
 0x139   : > { %v842_v19 = vpack.c.bf16 %v840_v18, %v839_v17 }
 0x13b   : > { %v846_v32 = vsel %vm845_vm3, %v842_v19, 0 }
 0x13c   : > { %v997_v33 = vcombine.low %v846_v32, %v846_v32  ;;  %v998_v34 = vcombine.high %v846_v32, %v846_v32 }
 0x13e   : > { %864 = vst.msk [vmem:[%s1434_s9 + $0x8] sm:$0xf] %vm861_vm0, %v997_v33  ;;  %865 = vst.msk [vmem:[%s1434_s9 + $0xc] sm:$0xf] %vm861_vm0, %v998_v34 }
 0x13f PF: > { %s13_s12 = sadd.s32 1, %s1227_s12  }
 0x140   : > { %p10_p4 = scmp.ge.s32.totalorder %s13_s12, 4  }
 0x142   :  { %12 = sbr.rel (!%p10_p4) target bundleno = 1 (0x1), region = 62 }

// kernel: lenet_forward.5
= control target key start
LH: loop header
LB: loop body
LE: loop exit
PB: predicated region body
PF: predicated region fallthrough
CT: control target
= control target key end

     0   :  { %vm1297_vm0 = vmmov 0   ;;  %s1620_s1 = inlined_call_operand.vmem [shape: bf16[1024,128], index: 1, kind: input, shape index: {}]   ;;  %s1621_s0 = inlined_call_operand.vmem [shape: bf16[8,1024], index: 0, kind: input, shape index: {}]   ;;  %s1622_s3 = inlined_call_operand.vmem [shape: bf16[128,128], index: 3, kind: input, shape index: {}]   ;;  %s1623_s5 = inlined_call_operand.vmem [shape: bf16[128,128], index: 5, kind: input, shape index: {}]   ;;  %s1624_s2 = inlined_call_operand.vmem [shape: f32[1,128], index: 2, kind: input, shape index: {}]   ;;  %s1625_s4 = inlined_call_operand.vmem [shape: f32[1,128], index: 4, kind: input, shape index: {}]   ;;  %s1626_s6 = inlined_call_operand.vmem [shape: f32[1,128], index: 6, kind: input, shape index: {}]   ;;  %s1627_s7 = inlined_call_operand.vmem [shape: f32[8,128], index: 7, kind: output, shape index: {}]  }
   0x1   :  { %v1208_v0 = vld [vmem:[%s1620_s1 + $0x78] sm:$0xff]   ;;  %v1212_v4 = vld [vmem:[%s1620_s1 + $0x70] sm:$0xff]   ;;  %v1216_v8 = vld [vmem:[%s1620_s1 + $0x68] sm:$0xff]  }
   0x2   :  { %v1209_v1 = vld [vmem:[%s1620_s1 + $0xf8] sm:$0xff]   ;;  %1060 = vmatprep.subr.bf16.mxu0 %v1208_v0  ;;  %v1213_v5 = vld [vmem:[%s1620_s1 + $0xf0] sm:$0xff]   ;;  %v1217_v9 = vld [vmem:[%s1620_s1 + $0xe8] sm:$0xff]  }
   0x3   :  { %v1210_v2 = vld [vmem:[%s1620_s1 + $0x38] sm:$0xff]   ;;  %1082 = vmatprep.subr.bf16.mxu1 %v1209_v1  ;;  %v1214_v6 = vld [vmem:[%s1620_s1 + $0x30] sm:$0xff]   ;;  %v1218_v10 = vld [vmem:[%s1620_s1 + $0x28] sm:$0xff]  }
   0x4   :  { %v1211_v3 = vld [vmem:[%s1620_s1 + $0xb8] sm:$0xff]   ;;  %1061 = vmatpush3.bf16.msra.mxu0 %v1210_v2  ;;  %v1215_v7 = vld [vmem:[%s1620_s1 + $0xb0] sm:$0xff]   ;;  %v1219_v11 = vld [vmem:[%s1620_s1 + $0xa8] sm:$0xff]  }
   0x5   :  { %1083 = vmatpush3.bf16.msra.mxu1 %v1211_v3  ;;  %1062 = vmatprep.subr.bf16.mxu0 %v1212_v4  ;;  %v1220_v12 = vld [vmem:[%s1620_s1 + $0x60] sm:$0xff]   ;;  %v1224_v16 = vld [vmem:[%s1620_s1 + $0x58] sm:$0xff]   ;;  %v1228_v20 = vld [vmem:[%s1620_s1 + $0x50] sm:$0xff]  }
   0x6   :  { %1084 = vmatprep.subr.bf16.mxu1 %v1213_v5  ;;  %v1221_v13 = vld [vmem:[%s1620_s1 + $0xe0] sm:$0xff]   ;;  %v1225_v17 = vld [vmem:[%s1620_s1 + $0xd8] sm:$0xff]   ;;  %v1229_v21 = vld [vmem:[%s1620_s1 + $0xd0] sm:$0xff]  }
   0x7   :  { %v1222_v14 = vld [vmem:[%s1620_s1 + $0x20] sm:$0xff]   ;;  %v1226_v18 = vld [vmem:[%s1620_s1 + $0x18] sm:$0xff]   ;;  %v1230_v22 = vld [vmem:[%s1620_s1 + $0x10] sm:$0xff]  }
   0x8   :  { %1063 = vmatpush3.bf16.msra.mxu0 %v1214_v6  ;;  %v1223_v15 = vld [vmem:[%s1620_s1 + $0xa0] sm:$0xff]   ;;  %v1227_v19 = vld [vmem:[%s1620_s1 + $0x98] sm:$0xff]   ;;  %v1231_v23 = vld [vmem:[%s1620_s1 + $0x90] sm:$0xff]  }
   0x9   :  { %1085 = vmatpush3.bf16.msra.mxu1 %v1215_v7  ;;  %1064 = vmatprep.subr.bf16.mxu0 %v1216_v8  ;;  %v1232_v24 = vld [vmem:[%s1620_s1 + $0x48] sm:$0xff]   ;;  %v1236_v28 = vld [vmem:[%s1620_s1 + $0x40] sm:$0xff]   ;;  %v1244_v38 = vld [vmem:[%s1620_s1 + $0x178] sm:$0xff]  }
   0xa   :  { %1086 = vmatprep.subr.bf16.mxu1 %v1217_v9  ;;  %v1233_v25 = vld [vmem:[%s1620_s1 + $0xc8] sm:$0xff]   ;;  %v1237_v29 = vld [vmem:[%s1620_s1 + $0xc0] sm:$0xff]   ;;  %v1245_v39 = vld [vmem:[%s1620_s1 + $0x1f8] sm:$0xff]  }
   0xb   :  { %v1234_v26 = vld [vmem:[%s1620_s1 + $0x8] sm:$0xff]   ;;  %v1238_v30 = vld [vmem:[%s1620_s1] sm:$0xff]   ;;  %v1246_v40 = vld [vmem:[%s1620_s1 + $0x138] sm:$0xff]  }
   0xc   :  { %1065 = vmatpush3.bf16.msra.mxu0 %v1218_v10  ;;  %v1235_v27 = vld [vmem:[%s1620_s1 + $0x88] sm:$0xff]   ;;  %v1239_v31 = vld [vmem:[%s1620_s1 + $0x80] sm:$0xff]   ;;  %v1247_v41 = vld [vmem:[%s1620_s1 + $0x1b8] sm:$0xff]  }
   0xd   :  { %1087 = vmatpush3.bf16.msra.mxu1 %v1219_v11  ;;  %1066 = vmatprep.subr.bf16.mxu0 %v1220_v12  ;;  %v27_v32 = vld [vmem:[%s1621_s0] sm:$0xff]  ;;  %v28_v33 = vld [vmem:[%s1621_s0 + $0x8] sm:$0xff]  ;;  %v1248_v42 = vld [vmem:[%s1620_s1 + $0x170] sm:$0xff]   ;;  %v1296_v12 = vmov 0.0  }
   0xe   :  { %1088 = vmatprep.subr.bf16.mxu1 %v1221_v13  ;;  %v970_v34 = vcombine.low %v27_v32, %v27_v32  ;;  %v971_v35 = vcombine.high %v27_v32, %v27_v32  ;;  %v972_v36 = vcombine.low %v28_v33, %v28_v33  ;;  %v973_v37 = vcombine.high %v28_v33, %v28_v33  ;;  %v1249_v43 = vld [vmem:[%s1620_s1 + $0x1f0] sm:$0xff]   ;;  %v1252_v46 = vld [vmem:[%s1620_s1 + $0x168] sm:$0xff]   ;;  %v1256_v50 = vld [vmem:[%s1620_s1 + $0x160] sm:$0xff]  }
   0xf   :  { %v1250_v44 = vld [vmem:[%s1620_s1 + $0x130] sm:$0xff]   ;;  %v1253_v47 = vld [vmem:[%s1620_s1 + $0x1e8] sm:$0xff]   ;;  %v1257_v51 = vld [vmem:[%s1620_s1 + $0x1e0] sm:$0xff]  }
  0x10   :  { %1067 = vmatpush3.bf16.msra.mxu0 %v1222_v14  ;;  %610 = vmatprep.mubr.bf16.mxu0 %v971_v35  ;;  %v1251_v45 = vld [vmem:[%s1620_s1 + $0x1b0] sm:$0xff]   ;;  %v1254_v48 = vld [vmem:[%s1620_s1 + $0x128] sm:$0xff]   ;;  %v1258_v52 = vld [vmem:[%s1620_s1 + $0x120] sm:$0xff]  }
  0x11   :  { %1089 = vmatpush3.bf16.msra.mxu1 %v1223_v15  ;;  %1068 = vmatprep.subr.bf16.mxu0 %v1224_v16  ;;  %v1255_v49 = vld [vmem:[%s1620_s1 + $0x1a8] sm:$0xff]   ;;  %v1259_v53 = vld [vmem:[%s1620_s1 + $0x1a0] sm:$0xff]   ;;  %v1260_v54 = vld [vmem:[%s1620_s1 + $0x158] sm:$0xff]  }
  0x12   :  { %1090 = vmatprep.subr.bf16.mxu1 %v1225_v17  ;;  %650 = vmatprep.mubr.bf16.mxu1 %v973_v37  ;;  %v1261_v55 = vld [vmem:[%s1620_s1 + $0x1d8] sm:$0xff]   ;;  %v1264_v58 = vld [vmem:[%s1620_s1 + $0x150] sm:$0xff]   ;;  %v1268_v62 = vld [vmem:[%s1620_s1 + $0x148] sm:$0xff]  }
  0x13   :  { %v1262_v56 = vld [vmem:[%s1620_s1 + $0x118] sm:$0xff]   ;;  %v1265_v59 = vld [vmem:[%s1620_s1 + $0x1d0] sm:$0xff]   ;;  %v1269_v63 = vld [vmem:[%s1620_s1 + $0x1c8] sm:$0xff]  }
  0x14   :  { %1069 = vmatpush3.bf16.msra.mxu0 %v1226_v18  ;;  %v1263_v57 = vld [vmem:[%s1620_s1 + $0x198] sm:$0xff]   ;;  %v1266_v60 = vld [vmem:[%s1620_s1 + $0x110] sm:$0xff]   ;;  %v1270_v0 = vld [vmem:[%s1620_s1 + $0x108] sm:$0xff]  }
  0x15   :  { %1091 = vmatpush3.bf16.msra.mxu1 %v1227_v19  ;;  %1070 = vmatprep.subr.bf16.mxu0 %v1228_v20  ;;  %v1267_v61 = vld [vmem:[%s1620_s1 + $0x190] sm:$0xff]   ;;  %v1271_v1 = vld [vmem:[%s1620_s1 + $0x188] sm:$0xff]   ;;  %v1272_v2 = vld [vmem:[%s1620_s1 + $0x140] sm:$0xff]  }
  0x16   :  { %1092 = vmatprep.subr.bf16.mxu1 %v1229_v21  ;;  %v1273_v3 = vld [vmem:[%s1620_s1 + $0x1c0] sm:$0xff]   ;;  %v29_v6 = vld [vmem:[%s1621_s0 + $0x10] sm:$0xff]  ;;  %v30_v9 = vld [vmem:[%s1621_s0 + $0x18] sm:$0xff] }
  0x17   :  { %v1274_v4 = vld [vmem:[%s1620_s1 + $0x100] sm:$0xff]   ;;  %v974_v7 = vcombine.low %v29_v6, %v29_v6  ;;  %v975_v8 = vcombine.high %v29_v6, %v29_v6  ;;  %v976_v10 = vcombine.low %v30_v9, %v30_v9  ;;  %v977_v11 = vcombine.high %v30_v9, %v30_v9  ;;  %v1280_v13 = vld [vmem:[%s1622_s3 + $0x38] sm:$0xff]   ;;  %v1281_v14 = vld [vmem:[%s1622_s3 + $0x30] sm:$0xff]  }
  0x18   :  { %1071 = vmatpush3.bf16.msra.mxu0 %v1230_v22  ;;  %v1275_v5 = vld [vmem:[%s1620_s1 + $0x180] sm:$0xff]   ;;  %v1282_v15 = vld [vmem:[%s1622_s3 + $0x28] sm:$0xff]   ;;  %v1284_v17 = vld [vmem:[%s1622_s3 + $0x18] sm:$0xff]  }
  0x19   :  { %1093 = vmatpush3.bf16.msra.mxu1 %v1231_v23  ;;  %1072 = vmatprep.subr.bf16.mxu0 %v1232_v24  ;;  %v1283_v16 = vld [vmem:[%s1622_s3 + $0x20] sm:$0xff]   ;;  %v1285_v18 = vld [vmem:[%s1622_s3 + $0x10] sm:$0xff]   ;;  %v1286_v19 = vld [vmem:[%s1622_s3 + $0x8] sm:$0xff]  }
  0x1a   :  { %1094 = vmatprep.subr.bf16.mxu1 %v1233_v25  ;;  %v1287_v20 = vld [vmem:[%s1622_s3] sm:$0xff]   ;;  %v1288_v21 = vld [vmem:[%s1623_s5 + $0x38] sm:$0xff]   ;;  %v1289_v22 = vld [vmem:[%s1623_s5 + $0x30] sm:$0xff]  }
  0x1b   :  { %v1290_v23 = vld [vmem:[%s1623_s5 + $0x28] sm:$0xff]   ;;  %v1291_v24 = vld [vmem:[%s1623_s5 + $0x20] sm:$0xff]   ;;  %v1292_v25 = vld [vmem:[%s1623_s5 + $0x18] sm:$0xff]  }
  0x1c   :  { %1073 = vmatpush3.bf16.msra.mxu0 %v1234_v26  ;;  %v1293_v26 = vld [vmem:[%s1623_s5 + $0x10] sm:$0xff]  }
  0x1d   :  { %1095 = vmatpush3.bf16.msra.mxu1 %v1235_v27  ;;  %1074 = vmatprep.subr.bf16.mxu0 %v1236_v28 }
  0x1e   :  { %1096 = vmatprep.subr.bf16.mxu1 %v1237_v29 }
  0x20   :  { %1075 = vmatpush3.bf16.msra.mxu0 %v1238_v30 }
  0x21   :  { %1097 = vmatpush3.bf16.msra.mxu1 %v1239_v31  ;;  %1104 = vmatprep.subr.bf16.mxu0 %v1244_v38 }
  0x22   :  { %1126 = vmatprep.subr.bf16.mxu1 %v1245_v39 }
  0x23   :  { %611 = vmatmul.mubr.bf16.vlgmr.msra.gmra.mxu0 %v970_v34 }
  0x24   :  { %651 = vmatmul.mubr.bf16.vlgmr.msra.gmra.mxu1 %v972_v36  ;;  %1105 = vmatpush3.bf16.msra.mxu0 %v1246_v40  ;;  %v969_v36 = vld [vmem:[%s1624_s2] ss:$0 sm:$0xff] }
  0x25   :  { %1127 = vmatpush3.bf16.msra.mxu1 %v1247_v41  ;;  %1106 = vmatprep.subr.bf16.mxu0 %v1248_v42 }
  0x26   :  { %1128 = vmatprep.subr.bf16.mxu1 %v1249_v43  ;;  %690 = vmatprep.mubr.bf16.mxu0 %v975_v8 }
  0x27   :  { %730 = vmatprep.mubr.bf16.mxu1 %v977_v11 }
  0x28   :  { %1107 = vmatpush3.bf16.msra.mxu0 %v1250_v44 }
  0x29   :  { %1129 = vmatpush3.bf16.msra.mxu1 %v1251_v45  ;;  %1108 = vmatprep.subr.bf16.mxu0 %v1252_v46 }
  0x2a   :  { %1130 = vmatprep.subr.bf16.mxu1 %v1253_v47 }
  0x2c   :  { %1109 = vmatpush3.bf16.msra.mxu0 %v1254_v48 }
  0x2d   :  { %1131 = vmatpush3.bf16.msra.mxu1 %v1255_v49  ;;  %1110 = vmatprep.subr.bf16.mxu0 %v1256_v50 }
  0x2e   :  { %1132 = vmatprep.subr.bf16.mxu1 %v1257_v51 }
  0x30   :  { %1111 = vmatpush3.bf16.msra.mxu0 %v1258_v52 }
  0x31   :  { %1133 = vmatpush3.bf16.msra.mxu1 %v1259_v53  ;;  %1112 = vmatprep.subr.bf16.mxu0 %v1260_v54  ;;  %v1294_v54 = vld [vmem:[%s1623_s5 + $0x8] sm:$0xff]  }
  0x32   :  { %1134 = vmatprep.subr.bf16.mxu1 %v1261_v55  ;;  %v1295_v55 = vld [vmem:[%s1623_s5] sm:$0xff]  }
  0x34   :  { %1113 = vmatpush3.bf16.msra.mxu0 %v1262_v56  ;;  %v1042_v56 = vld [vmem:[%s1625_s4] ss:$0 sm:$0xff] }
  0x35   :  { %1135 = vmatpush3.bf16.msra.mxu1 %v1263_v57  ;;  %1114 = vmatprep.subr.bf16.mxu0 %v1264_v58 }
  0x36   :  { %1136 = vmatprep.subr.bf16.mxu1 %v1265_v59 }
  0x38   :  { %1115 = vmatpush3.bf16.msra.mxu0 %v1266_v60 }
  0x39   :  { %1137 = vmatpush3.bf16.msra.mxu1 %v1267_v61  ;;  %1116 = vmatprep.subr.bf16.mxu0 %v1268_v62 }
  0x3a   :  { %1138 = vmatprep.subr.bf16.mxu1 %v1269_v63 }
  0x3c   :  { %1117 = vmatpush3.bf16.msra.mxu0 %v1270_v0  ;;  %v1051_v0 = vld [vmem:[%s1626_s6] ss:$0 sm:$0xff] }
  0x3d   :  { %1139 = vmatpush3.bf16.msra.mxu1 %v1271_v1  ;;  %1118 = vmatprep.subr.bf16.mxu0 %v1272_v2 }
  0x3e   :  { %1140 = vmatprep.subr.bf16.mxu1 %v1273_v3 }
  0x40   :  { %1119 = vmatpush3.bf16.msra.mxu0 %v1274_v4 }
  0x41   :  { %1141 = vmatpush3.bf16.msra.mxu1 %v1275_v5  ;;  %1166 = vmatprep.subr.bf16.mxu0 %v1296_v12 }
  0x42   :  { %1186 = vmatprep.subr.bf16.mxu1 %v1296_v12 }
  0x43   :  { %691 = vmatmul.mubr.bf16.vlgmr.msra.gmra.mxu0 %v974_v7 }
  0x44   :  { %731 = vmatmul.mubr.bf16.vlgmr.msra.gmra.mxu1 %v976_v10  ;;  %1167 = vmatpush3.bf16.msra.mxu0 %v1280_v13 }
  0x45   :  { %1168 = vmatprep.subr.bf16.mxu0 %v1296_v12  ;;  %1182 = vmatprep.mubr.msk.bf16.mxu0 %vm1297_vm0, %v1296_v12 }
  0x46   :  { %1202 = vmatprep.mubr.msk.bf16.mxu1 %vm1297_vm0, %v1296_v12  ;;  %1187 = vmatpush3.bf16.msra.mxu1 %v1288_v21 }
  0x47   :  { %1188 = vmatprep.subr.bf16.mxu1 %v1296_v12 }
  0x48   :  { %1169 = vmatpush3.bf16.msra.mxu0 %v1281_v14 }
  0x49   :  { %1170 = vmatprep.subr.bf16.mxu0 %v1296_v12 }
  0x4a   :  { %1189 = vmatpush3.bf16.msra.mxu1 %v1289_v22 }
  0x4b   :  { %1190 = vmatprep.subr.bf16.mxu1 %v1296_v12 }
  0x4c   :  { %1171 = vmatpush3.bf16.msra.mxu0 %v1282_v15 }
  0x4d   :  { %1172 = vmatprep.subr.bf16.mxu0 %v1296_v12 }
  0x4e   :  { %1191 = vmatpush3.bf16.msra.mxu1 %v1290_v23 }
  0x4f   :  { %1192 = vmatprep.subr.bf16.mxu1 %v1296_v12 }
  0x50   :  { %1173 = vmatpush3.bf16.msra.mxu0 %v1283_v16 }
  0x51   :  { %1174 = vmatprep.subr.bf16.mxu0 %v1296_v12 }
  0x52   :  { %1193 = vmatpush3.bf16.msra.mxu1 %v1291_v24 }
  0x53   :  { %1194 = vmatprep.subr.bf16.mxu1 %v1296_v12 }
  0x54   :  { %1175 = vmatpush3.bf16.msra.mxu0 %v1284_v17 }
  0x55   :  { %1176 = vmatprep.subr.bf16.mxu0 %v1296_v12 }
  0x56   :  { %1195 = vmatpush3.bf16.msra.mxu1 %v1292_v25 }
  0x57   :  { %1196 = vmatprep.subr.bf16.mxu1 %v1296_v12 }
  0x58   :  { %1177 = vmatpush3.bf16.msra.mxu0 %v1285_v18 }
  0x59   :  { %1178 = vmatprep.subr.bf16.mxu0 %v1296_v12 }
  0x5a   :  { %1197 = vmatpush3.bf16.msra.mxu1 %v1293_v26 }
  0x5b   :  { %1198 = vmatprep.subr.bf16.mxu1 %v1296_v12 }
  0x5c   :  { %1179 = vmatpush3.bf16.msra.mxu0 %v1286_v19 }
  0x5d   :  { %1180 = vmatprep.subr.bf16.mxu0 %v1296_v12 }
  0x5e   :  { %1199 = vmatpush3.bf16.msra.mxu1 %v1294_v54 }
  0x5f   :  { %1200 = vmatprep.subr.bf16.mxu1 %v1296_v12 }
  0x60   :  { %1181 = vmatpush3.bf16.msra.mxu0 %v1287_v20 }
  0x62   :  { %1201 = vmatpush3.bf16.msra.mxu1 %v1295_v55 }
  0xe3   :  { %v1076_v27 = vpop.f32.mrf.mxu0 }
  0xe4   :  { %v1098_v28 = vpop.f32.mrf.mxu1 }
  0xe5   :  { %v1077_v29 = vpop.f32.mrf.mxu0 }
  0xe6   :  { %v1099_v30 = vpop.f32.mrf.mxu1  ;;  %v1078_v35 = vadd.f32 %v1077_v29, %v1076_v27 }
  0xe7   :  { %v1079_v31 = vpop.f32.mrf.mxu0  ;;  %v1100_v38 = vadd.f32 %v1099_v30, %v1098_v28 }
  0xe8   :  { %v1101_v32 = vpop.f32.mrf.mxu1  ;;  %v613_v37 = vadd.f32 %v1078_v35, %v969_v36 }
  0xe9   :  { %v1080_v33 = vpop.f32.mrf.mxu0 }
  0xea   :  { %v1102_v34 = vpop.f32.mrf.mxu1  ;;  %v653_v43 = vadd.f32 %v1100_v38, %v613_v37 }
 0x103   :  { %v1120_v39 = vpop.f32.mrf.mxu0 }
 0x104   :  { %v1142_v40 = vpop.f32.mrf.mxu1 }
 0x105   :  { %v1121_v41 = vpop.f32.mrf.mxu0 }
 0x106   :  { %v1143_v42 = vpop.f32.mrf.mxu1  ;;  %v1122_v44 = vadd.f32 %v1121_v41, %v1120_v39 }
 0x107   :  { %v1123_v45 = vpop.f32.mrf.mxu0  ;;  %v1144_v48 = vadd.f32 %v1143_v42, %v1142_v40 }
 0x108   :  { %v1145_v46 = vpop.f32.mrf.mxu1  ;;  %v693_v47 = vadd.f32 %v1122_v44, %v653_v43 }
 0x109   :  { %v1124_v49 = vpop.f32.mrf.mxu0 }
 0x10a   :  { %v1146_v50 = vpop.f32.mrf.mxu1  ;;  %v733_v51 = vadd.f32 %v1144_v48, %v693_v47 }
 0x10c   :  { %v738_v52 = vmax.f32 %v733_v51, 0.0 }
 0x10e   :  { %v739_v53 = vpack.c.bf16 %v738_v52, %v738_v52 }
 0x110   :  { %1183 = vmatmul.mubr.bf16.vlgmr.msra.gmra.mxu0 %v739_v53 }
 0x1d0   :  { %v845_v57 = vpop.f32.mrf.mxu0 }
 0x1d1   :  { %v846_v58 = vadd.f32 %v1042_v56, %v845_v57 }
 0x1d2   :  { %v1184_v59 = vpop.f32.mrf.mxu0 }
 0x1d3   :  { %v851_v60 = vmax.f32 %v846_v58, 0.0 }
 0x1d4   :  { %v848_v61 = vpop.f32.mrf.mxu0 }
 0x1d5   :  { %v852_v62 = vpack.c.bf16 %v851_v60, %v851_v60 }
 0x1d6   :  { %v1185_v63 = vpop.f32.mrf.mxu0 }
 0x1d7   :  { %1203 = vmatmul.mubr.bf16.vlgmr.msra.gmra.mxu1 %v852_v62 }
 0x297   :  { %v958_v1 = vpop.f32.mrf.mxu1 }
 0x298   :  { %v959_v2 = vadd.f32 %v1051_v0, %v958_v1 }
 0x299   :  { %v1204_v3 = vpop.f32.mrf.mxu1 }
 0x29a   :  { %964 = vst [vmem:[%s1627_s7] sm:$0xff] %v959_v2 }
 0x29b   :  { %v961_v4 = vpop.f32.mrf.mxu1 }
 0x29d   :  { %v1205_v5 = vpop.f32.mrf.mxu1 }

</bundles_post_ra>
